<compile_context>
chip_gen: v5e
topology: v5e:2x2
jax: 0.10.0
libtpu: 0.0.40
codegen_flags: <defaults>
</compile_context>

<pallas_src>
import functools

import jax
import jax.numpy as jnp
from jax.experimental import pallas as pl
from jax.experimental.pallas import tpu as pltpu


def _residual_ff_kernel(x_ref, w1_ref, b1_ref, w2_ref, b2_ref, o_ref, acc_ref):
    k = pl.program_id(1)

    @pl.when(k == 0)
    def _():
        acc_ref[...] = jnp.zeros_like(acc_ref)

    # x tile (TM, H) f32; constant block index over k -> VMEM-resident, cheap load.
    x = x_ref[...]

    # First linear on this Hm chunk: bf16 MXU operands, f32 accumulation.
    h = jnp.dot(x.astype(jnp.bfloat16), w1_ref[...],
                preferred_element_type=jnp.float32)          # (TM, THm) f32
    h = jax.nn.gelu(h + b1_ref[...])
    # TODO(synk): jax.nn.gelu is the tanh approximation; PyTorch nn.GELU
    # defaults to exact erf (~1e-3 deviation).  fn is synthetic here.

    # Second linear: accumulate this chunk's contribution into the f32 scratch.
    acc_ref[...] += jnp.dot(h.astype(jnp.bfloat16), w2_ref[...],
                            preferred_element_type=jnp.float32)  # (TM, H) f32

    @pl.when(k == pl.num_programs(1) - 1)
    def _():
        # ResidualAdd: out = fn(x) + x  (bias + residual in f32, single cast).
        o_ref[...] = (acc_ref[...] + b2_ref[...] + x).astype(o_ref.dtype)


def _pick_tile(total, want, quantum):
    """Largest tile <= want that divides `total` and is a multiple of `quantum`
    (returns `total` itself if total <= want or no such divisor exists)."""
    if total <= want:
        return total
    t = (min(want, total) // quantum) * quantum
    while t >= quantum:
        if total % t == 0:
            return t
        t -= quantum
    return total


@functools.partial(jax.jit, static_argnames=("tm", "thm"))
def residual_add_ff(x, w1, b1, w2, b2, *, tm=256, thm=1024):
    """out = GELU(x @ w1 + b1) @ w2 + b2 + x, fused in one Pallas kernel.

    x : (N, H) f32   w1 : (H, Hm)   b1 : (1, Hm)   w2 : (Hm, H)   b2 : (1, H)
    H should be a multiple of 128; Hm a multiple of 128 (else it runs unchunked).
    """
    n, h = x.shape
    hm = w1.shape[1]

    # bf16 weights: halves HBM traffic and the VMEM footprint of the streamed
    # weight chunks; accumulation stays f32 inside the kernel.
    w1 = w1.astype(jnp.bfloat16)
    w2 = w2.astype(jnp.bfloat16)
    b1 = b1.astype(jnp.float32)
    b2 = b2.astype(jnp.float32)

    # ---- tile selection ----------------------------------------------------
    tm_eff = _pick_tile(n, tm, 8)        # token tile (sublane axis)
    pad_rows = 0
    if tm_eff > 2 * tm:
        # No reasonable divisor of N near the requested tile: pad the tail.
        # TODO(synk): mask the last tile's store / run the ragged tail
        # separately instead of materializing a padded copy of x.
        tm_eff = tm
        n_pad = pl.cdiv(n, tm_eff) * tm_eff
        pad_rows = n_pad - n
        x = jnp.pad(x, ((0, pad_rows), (0, 0)))
    n_tok = x.shape[0]

    thm_eff = _pick_tile(hm, thm, 128)   # Hm chunk (lane axis of W1 / sublane of W2)
    grid = (n_tok // tm_eff, hm // thm_eff)

    # ---- VMEM budget: footprint + headroom, capped below v7x physical -------
    bpf32, bpbf16 = 4, 2
    footprint = (
        2 * tm_eff * h * bpf32            # x tile (double-buffered)
        + 2 * tm_eff * h * bpf32          # out tile (double-buffered)
        + 2 * h * thm_eff * bpbf16        # W1 chunk (double-buffered, streamed over k)
        + 2 * thm_eff * h * bpbf16        # W2 chunk (double-buffered, streamed over k)
        + 2 * 8 * thm_eff * bpf32         # b1 (sublane-padded)
        + 2 * 8 * h * bpf32               # b2
        + tm_eff * h * bpf32              # f32 accumulator scratch
        + tm_eff * thm_eff * bpf32        # (TM, THm) f32 intermediate
    )
    # Never request the full 64 MiB physical VMEM of v7x; 48 MiB cap is also
    # comfortably within v5e/v6e's 128 MiB.
    vmem_limit = int(min(48 * 1024 * 1024, max(32 * 1024 * 1024, 2 * footprint)))

    out = pl.pallas_call(
        _residual_ff_kernel,
        out_shape=jax.ShapeDtypeStruct((n_tok, h), x.dtype),
        grid_spec=pltpu.PrefetchScalarGridSpec(
            num_scalar_prefetch=0,
            grid=grid,
            in_specs=[
                # x: one (TM, H) token tile, constant over k -> resident per i.
                pl.BlockSpec((tm_eff, h), lambda i, k: (i, 0)),
                # W1 / b1 / W2: streamed per Hm chunk (pipelined over k).
                pl.BlockSpec((h, thm_eff), lambda i, k: (0, k)),
                pl.BlockSpec((1, thm_eff), lambda i, k: (0, k)),
                pl.BlockSpec((thm_eff, h), lambda i, k: (k, 0)),
                # b2: constant block -> fetched once, VMEM-resident.
                pl.BlockSpec((1, h), lambda i, k: (0, 0)),
            ],
            out_specs=pl.BlockSpec((tm_eff, h), lambda i, k: (i, 0)),
            scratch_shapes=[pltpu.VMEM((tm_eff, h), jnp.float32)],
        ),
        compiler_params=pltpu.CompilerParams(
            # Token tiles independent (megacore sharding on v7x; no-op on
            # single-TC parts); Hm chunks form the reduction axis.
            dimension_semantics=("parallel", "arbitrary"),
            vmem_limit_bytes=vmem_limit,
        ),
    )(x, w1, b1, w2, b2)

    return out[:n] if pad_rows else out


if __name__ == "__main__":
    key = jax.random.PRNGKey(0)
    # Small, lane-aligned shapes that still exercise both grid axes:
    # N = 4*128 = 512 tokens -> 2 token tiles of 256; Hm = 512 -> 2 chunks of 256.
    batch, seq, hidden, mlp = 4, 128, 128, 512

    k_x, k_w1, k_b1, k_w2, k_b2 = jax.random.split(key, 5)
    x = jax.random.normal(k_x, (batch, seq, hidden), dtype=jnp.float32)
    # Deterministic synthetic parameters for fn (FeedForward MLP).
    w1 = jax.random.normal(k_w1, (hidden, mlp), dtype=jnp.float32) * 0.05
    b1 = jax.random.normal(k_b1, (1, mlp), dtype=jnp.float32) * 0.01
    w2 = jax.random.normal(k_w2, (mlp, hidden), dtype=jnp.float32) * 0.05
    b2 = jax.random.normal(k_b2, (1, hidden), dtype=jnp.float32) * 0.01

    # Flatten tokens: (B, S, H) -> (B*S, H); hidden on lanes, tokens on sublanes.
    x2d = x.reshape(batch * seq, hidden)
    out = residual_add_ff(x2d, w1, b1, w2, b2, tm=256, thm=256)
    out = out.reshape(batch, seq, hidden)
    jax.block_until_ready(out)

    # Reference with the same precision recipe (bf16 MXU operands, f32
    # accumulation / epilogue):  out = fn(x) + x.
    w1_bf = w1.astype(jnp.bfloat16)
    w2_bf = w2.astype(jnp.bfloat16)
    h_ref = jnp.dot(x2d.astype(jnp.bfloat16), w1_bf,
                    preferred_element_type=jnp.float32) + b1
    h_ref = jax.nn.gelu(h_ref)
    ref = jnp.dot(h_ref.astype(jnp.bfloat16), w2_bf,
                  preferred_element_type=jnp.float32) + b2 + x2d
    ref = ref.reshape(batch, seq, hidden)
    assert jnp.allclose(out, ref, atol=2e-3, rtol=2e-3), "mismatch vs reference"

    print("KERNEL_OK")
</pallas_src>

<mosaic_0001>
module attributes {stable_mosaic.version = 11 : i64} {
  func.func @_residual_ff_kernel(%arg0: i32, %arg1: i32, %arg2: memref<256x128xf32, #tpu.memory_space<vmem>>, %arg3: memref<128x256xbf16, #tpu.memory_space<vmem>>, %arg4: memref<1x256xf32, #tpu.memory_space<vmem>>, %arg5: memref<256x128xbf16, #tpu.memory_space<vmem>>, %arg6: memref<1x128xf32, #tpu.memory_space<vmem>>, %arg7: memref<256x128xf32, #tpu.memory_space<vmem>>, %arg8: memref<256x128xf32, #tpu.memory_space<vmem>>) attributes {dimension_semantics = [#tpu.dimension_semantics<parallel>, #tpu.dimension_semantics<arbitrary>], iteration_bounds = array<i64: 2, 2>, scalar_prefetch = 0 : i64, scratch_operands = 1 : i64, tpu.core_type = #tpu.core_type<tc>, window_params = [{transform_indices = @transform_0, window_bounds = array<i64: 256, 128>}, {transform_indices = @transform_1, window_bounds = array<i64: 128, 256>}, {transform_indices = @transform_2, window_bounds = array<i64: 1, 256>}, {transform_indices = @transform_3, window_bounds = array<i64: 256, 128>}, {pipeline_mode = #tpu.pipeline_mode<synchronous>, transform_indices = @transform_4, window_bounds = array<i64: 1, 128>}, {transform_indices = @transform_5, window_bounds = array<i64: 256, 128>}]} {
    %c0_i32 = arith.constant 0 : i32
    %0 = arith.cmpi eq, %arg1, %c0_i32 : i32
    %1 = arith.extui %0 : i1 to i32
    %c0_i32_0 = arith.constant 0 : i32
    %2 = arith.cmpi ne, %1, %c0_i32_0 : i32
    scf.if %2 {
      %cst_18 = arith.constant 0.000000e+00 : f32
      %32 = vector.broadcast %cst_18 : f32 to vector<256x128xf32>
      %c0_19 = arith.constant 0 : index
      %c0_20 = arith.constant 0 : index
      %33 = vector.load %arg8[%c0_19, %c0_20] : memref<256x128xf32, #tpu.memory_space<vmem>>, vector<256x128xf32>
      tpu.vector_store %arg8[%c0_19, %c0_20], %32 {strides = array<i32>} : memref<256x128xf32, #tpu.memory_space<vmem>>, vector<256x128xf32>,
    } else {
    }
    %c0 = arith.constant 0 : index
    %c0_1 = arith.constant 0 : index
    %3 = vector.load %arg2[%c0, %c0_1] : memref<256x128xf32, #tpu.memory_space<vmem>>, vector<256x128xf32>
    %4 = arith.truncf %3 : vector<256x128xf32> to vector<256x128xbf16>
    %c0_2 = arith.constant 0 : index
    %c0_3 = arith.constant 0 : index
    %5 = vector.load %arg3[%c0_2, %c0_3] : memref<128x256xbf16, #tpu.memory_space<vmem>>, vector<128x256xbf16>
    %cst = arith.constant dense<0.000000e+00> : vector<256x256xf32>
    %6 = tpu.matmul %4, %5, %cst {dimension_numbers = #tpu.dot_dimension_numbers<[1], [0], [0], [1], [0, 0, 1, 1], [], []>} : vector<256x128xbf16>, vector<128x256xbf16>, vector<256x256xf32> -> vector<256x256xf32>
    %c0_4 = arith.constant 0 : index
    %c0_5 = arith.constant 0 : index
    %7 = vector.load %arg4[%c0_4, %c0_5] : memref<1x256xf32, #tpu.memory_space<vmem>>, vector<1x256xf32>
    %8 = vector.broadcast %7 : vector<1x256xf32> to vector<256x256xf32>
    %9 = arith.addf %6, %8 : vector<256x256xf32>
    %10 = arith.mulf %9, %9 : vector<256x256xf32>
    %11 = arith.mulf %9, %10 : vector<256x256xf32>
    %cst_6 = arith.constant 4.471500e-02 : f32
    %12 = vector.broadcast %cst_6 : f32 to vector<256x256xf32>
    %13 = arith.mulf %12, %11 : vector<256x256xf32>
    %14 = arith.addf %9, %13 : vector<256x256xf32>
    %cst_7 = arith.constant 0.797884583 : f32
    %15 = vector.broadcast %cst_7 : f32 to vector<256x256xf32>
    %16 = arith.mulf %15, %14 : vector<256x256xf32>
    %17 = math.tanh %16 : vector<256x256xf32>
    %cst_8 = arith.constant 1.000000e+00 : f32
    %18 = vector.broadcast %cst_8 : f32 to vector<256x256xf32>
    %19 = arith.addf %18, %17 : vector<256x256xf32>
    %cst_9 = arith.constant 5.000000e-01 : f32
    %20 = vector.broadcast %cst_9 : f32 to vector<256x256xf32>
    %21 = arith.mulf %20, %19 : vector<256x256xf32>
    %22 = arith.mulf %9, %21 : vector<256x256xf32>
    %c0_10 = arith.constant 0 : index
    %c0_11 = arith.constant 0 : index
    %23 = vector.load %arg8[%c0_10, %c0_11] : memref<256x128xf32, #tpu.memory_space<vmem>>, vector<256x128xf32>
    %24 = arith.truncf %22 : vector<256x256xf32> to vector<256x256xbf16>
    %c0_12 = arith.constant 0 : index
    %c0_13 = arith.constant 0 : index
    %25 = vector.load %arg5[%c0_12, %c0_13] : memref<256x128xbf16, #tpu.memory_space<vmem>>, vector<256x128xbf16>
    %cst_14 = arith.constant dense<0.000000e+00> : vector<256x128xf32>
    %26 = tpu.matmul %24, %25, %cst_14 {dimension_numbers = #tpu.dot_dimension_numbers<[1], [0], [0], [1], [0, 0, 1, 1], [], []>} : vector<256x256xbf16>, vector<256x128xbf16>, vector<256x128xf32> -> vector<256x128xf32>
    %27 = arith.addf %23, %26 : vector<256x128xf32>
    %c0_15 = arith.constant 0 : index
    %c0_16 = arith.constant 0 : index
    %28 = vector.load %arg8[%c0_15, %c0_16] : memref<256x128xf32, #tpu.memory_space<vmem>>, vector<256x128xf32>
    tpu.vector_store %arg8[%c0_15, %c0_16], %27 {strides = array<i32>} : memref<256x128xf32, #tpu.memory_space<vmem>>, vector<256x128xf32>,
    %c1_i32 = arith.constant 1 : i32
    %29 = arith.cmpi eq, %arg1, %c1_i32 : i32
    %30 = arith.extui %29 : i1 to i32
    %c0_i32_17 = arith.constant 0 : i32
    %31 = arith.cmpi ne, %30, %c0_i32_17 : i32
    scf.if %31 {
      %c0_18 = arith.constant 0 : index
      %c0_19 = arith.constant 0 : index
      %32 = vector.load %arg8[%c0_18, %c0_19] : memref<256x128xf32, #tpu.memory_space<vmem>>, vector<256x128xf32>
      %c0_20 = arith.constant 0 : index
      %c0_21 = arith.constant 0 : index
      %33 = vector.load %arg6[%c0_20, %c0_21] : memref<1x128xf32, #tpu.memory_space<vmem>>, vector<1x128xf32>
      %34 = vector.broadcast %33 : vector<1x128xf32> to vector<256x128xf32>
      %35 = arith.addf %32, %34 : vector<256x128xf32>
      %36 = arith.addf %35, %3 : vector<256x128xf32>
      %c0_22 = arith.constant 0 : index
      %c0_23 = arith.constant 0 : index
      %37 = vector.load %arg7[%c0_22, %c0_23] : memref<256x128xf32, #tpu.memory_space<vmem>>, vector<256x128xf32>
      tpu.vector_store %arg7[%c0_22, %c0_23], %36 {strides = array<i32>} : memref<256x128xf32, #tpu.memory_space<vmem>>, vector<256x128xf32>,
    } else {
    }
    return
  }
  func.func @transform_0(%arg0: i32, %arg1: i32) -> (i32, i32) {
    %c0_i32 = arith.constant 0 : i32
    %c0_i32_0 = arith.constant 0 : i32
    return %arg0, %c0_i32 : i32, i32
  }
  func.func @transform_1(%arg0: i32, %arg1: i32) -> (i32, i32) {
    %c0_i32 = arith.constant 0 : i32
    %c0_i32_0 = arith.constant 0 : i32
    return %c0_i32, %arg1 : i32, i32
  }
  func.func @transform_2(%arg0: i32, %arg1: i32) -> (i32, i32) {
    %c0_i32 = arith.constant 0 : i32
    %c0_i32_0 = arith.constant 0 : i32
    return %c0_i32, %arg1 : i32, i32
  }
  func.func @transform_3(%arg0: i32, %arg1: i32) -> (i32, i32) {
    %c0_i32 = arith.constant 0 : i32
    %c0_i32_0 = arith.constant 0 : i32
    return %arg1, %c0_i32 : i32, i32
  }
  func.func @transform_4(%arg0: i32, %arg1: i32) -> (i32, i32) {
    %c0_i32 = arith.constant 0 : i32
    %c0_i32_0 = arith.constant 0 : i32
    %c0_i32_1 = arith.constant 0 : i32
    return %c0_i32, %c0_i32_0 : i32, i32
  }
  func.func @transform_5(%arg0: i32, %arg1: i32) -> (i32, i32) {
    %c0_i32 = arith.constant 0 : i32
    %c0_i32_0 = arith.constant 0 : i32
    return %arg0, %c0_i32 : i32, i32
  }
}

</mosaic_0001>

<bundles_post_ra>
// kernel: residual_add_ff.1
= control target key start
LH: loop header
LB: loop body
LE: loop exit
PB: predicated region body
PF: predicated region fallthrough
CT: control target
= control target key end

     0   :  { %s3578_s0 = inlined_call_operand.vmem [shape: f32[512,128], index: 0, kind: input, shape index: {}]   ;;  %s3579_s1 = inlined_call_operand.vmem [shape: bf16[128,512], index: 1, kind: input, shape index: {}]   ;;  %s3580_s2 = inlined_call_operand.vmem [shape: f32[1,512], index: 2, kind: input, shape index: {}]   ;;  %s3581_s3 = inlined_call_operand.vmem [shape: bf16[512,128], index: 3, kind: input, shape index: {}]   ;;  %s3582_s4 = inlined_call_operand.vmem [shape: f32[1,128], index: 4, kind: input, shape index: {}]   ;;  %s3583_s5 = inlined_call_operand.hbm [shape: f32[512,128], index: 5, kind: output, shape index: {}]  }
   0x1   :  { %3591 = sst [smem:[#allocation14_spill]] %s3579_s1 }
   0x2   :  { %10 = vsyncpa [#allocation5], 0 }
   0x3   :  { %12 = vsyncpa [#allocation5 + $0x1], 0  ;;  %s2582_s18 = smov 0   ;;  %s2584_s19 = smov 0  }
   0x4   :  { %s2586_s20 = smov 0   ;;  %s2588_s21 = smov 0  }
   0x5   :  { %s2590_s22 = smov 0   ;;  %s2592_s23 = smov 0  }
   0x6   :  { %s2594_s24 = smov 0   ;;  %s2596_s25 = smov 0  }
   0x7   :  { %s2598_s26 = smov 0   ;;  %s2600_s27 = smov 0  }
   0x8 LB: > { %3592 = sst [smem:[#allocation7_spill]] %s2527_s22  ;;  %s2034_s28 = sadd.s32 4294967295, %s2547_s27   ;;  %s2547_s27 = sphi %s2600_s27, %s18_s27   ;;  %s2543_s26 = sphi %s2598_s26, %s3610_s26   ;;  %s2539_s25 = sphi %s2596_s25, %s3609_s25   ;;  %s2535_s24 = sphi %s2594_s24, %s3608_s24   ;;  %s2531_s23 = sphi %s2592_s23, %s3607_s23   ;;  %s2527_s22 = sphi %s2590_s22, %s3606_s22   ;;  %s2523_s21 = sphi %s2588_s21, %s3605_s21   ;;  %s2519_s20 = sphi %s2586_s20, %s3613_s20   ;;  %s2515_s19 = sphi %s2584_s19, %s3612_s19   ;;  %s2511_s18 = sphi %s2582_s18, %s3611_s18  }
   0x9   : > { %3593 = sst [smem:[#allocation8_spill]] %s2539_s25  ;;  %s2035_s29 = sadd.s32 4294967294, %s2547_s27  }
   0xa   : > { %3594 = sst [smem:[#allocation9_spill]] %s2543_s26  ;;  %s27_s30 = sadd.s32 1, %s2539_s25 }
   0xb   : > { %s30_s6 = sadd.s32 1, %s2543_s26  ;;  %p28_p0 = scmp.ge.s32.totalorder %s27_s30, 2 }
   0xc   : > { %s63_s7 = sadd.s32 1, %s2527_s22  ;;  %p70_p1 = scmp.ne.s32.totalorder %s2527_s22, %s2523_s21 }
   0xd   : > { %p71_p2 = scmp.eq.s32.totalorder %s2547_s27, 0  ;;  %s3615_s30 = smov (%p28_p0, %s27_s30), 0 }
   0xe   : > { %3595 = sst [smem:[#allocation10_spill]] %s3615_s30  ;;  %s3617_s6 = smov (!%p28_p0, %s30_s6), %s2543_s26 }
   0xf   : > { %s60_s8 = ssub.s32 %s2539_s25, %s3615_s30  ;;  %p2645_p3 = por %p71_p2, %p70_p1 }
  0x10   : > { %p32_p4 = scmp.ge.s32.totalorder %s3617_s6, 2  ;;  %p61_p5 = scmp.eq.s32.totalorder %s60_s8, 0 }
  0x11   : > { %s162_s10 = sadd.s32 1, %s2519_s20  ;;  %p172_p6 = scmp.ne.s32.totalorder %s2519_s20, %s2515_s19 }
  0x12   : > { %s3619_s6 = smov (%p32_p4, %s3617_s6), 0  ;;  %p173_p7 = scmp.eq.s32.totalorder %s2034_s28, 3 }
  0x13   : > { %3597 = sst [smem:[#allocation11_spill]] %s3619_s6  ;;  %s159_s12 = ssub.s32 %s2543_s26, %s3619_s6 }
  0x14   : > { %s2655_s11 = scalar_select %p61_p5, %s2527_s22, %s63_s7  }
  0x15   : > { %p160_p8 = scmp.eq.s32.totalorder %s159_s12, 0  ;;  %p178_p9 = scmp.ne.s32.totalorder %s2515_s19, %s2511_s18 }
  0x16   : > { %3598 = sst [smem:[#allocation12_spill]] %s2655_s11  ;;  %p2661_p10 = por %p173_p7, %p172_p6 }
  0x17   : > { %p179_p11 = scmp.eq.s32.totalorder %s2035_s29, 3  ;;  %p2037_p13 = scmp.ge.s32.totalorder %s2547_s27, 4 }
  0x18   : > { %s2666_s14 = scalar_select %p160_p8, %s2519_s20, %s162_s10  }
  0x19   : > { %p2668_p12 = por %p179_p11, %p178_p9  ;;  %198 = sbr.rel (%p2037_p13) target bundleno = 56 (0x38), region = 20 }
  0x1e   : > { %210 = sbr.rel (!%p2645_p3) target bundleno = 56 (0x38), region = 28  ;;  %s212_s16 = sand.u32 (%p2645_p3), 1, %s2527_s22  }
  0x1f   : > { %s2184_s17 = sshll.u32 (%p2645_p3), %s2539_s25, 3  ;;  %s2038_s28 = sshll.u32 (%p2645_p3), %s212_s16, 7 }
  0x20   : > { %s3601_s1 = sld [smem:[#allocation14_spill]] (%p2645_p3)  ;;  %s214_s9 = scalar_lea.vmem (%p2645_p3), [#allocation3], %s2038_s28 }
  0x26   : > { %s2680_s29 = scalar_lea.vmem %s3601_s1, %s2184_s17 }
  0x27   : > { %v276_v0 = vld [vmem:[%s2680_s29] sm:$0xff]  ;;  %v278_v1 = vld [vmem:[%s2680_s29 + $0x10] sm:$0xff] }
  0x28   : > { %v280_v2 = vld [vmem:[%s2680_s29 + $0x20] sm:$0xff]  ;;  %277 = vst [vmem:[%s214_s9] sm:$0xff] %v276_v0  ;;  %v282_v3 = vld [vmem:[%s2680_s29 + $0x30] sm:$0xff] }
  0x29   : > { %279 = vst [vmem:[%s214_s9 + $0x8] sm:$0xff] %v278_v1  ;;  %v284_v4 = vld [vmem:[%s2680_s29 + $0x40] sm:$0xff]  ;;  %v286_v5 = vld [vmem:[%s2680_s29 + $0x50] sm:$0xff] }
  0x2a   : > { %281 = vst [vmem:[%s214_s9 + $0x10] sm:$0xff] %v280_v2  ;;  %v288_v6 = vld [vmem:[%s2680_s29 + $0x60] sm:$0xff]  ;;  %v290_v7 = vld [vmem:[%s2680_s29 + $0x70] sm:$0xff] }
  0x2b   : > { %283 = vst [vmem:[%s214_s9 + $0x18] sm:$0xff] %v282_v3  ;;  %v292_v8 = vld [vmem:[%s2680_s29 + $0x80] sm:$0xff]  ;;  %v294_v9 = vld [vmem:[%s2680_s29 + $0x90] sm:$0xff] }
  0x2c   : > { %285 = vst [vmem:[%s214_s9 + $0x20] sm:$0xff] %v284_v4  ;;  %v296_v10 = vld [vmem:[%s2680_s29 + $0xa0] sm:$0xff]  ;;  %v298_v11 = vld [vmem:[%s2680_s29 + $0xb0] sm:$0xff] }
  0x2d   : > { %287 = vst [vmem:[%s214_s9 + $0x28] sm:$0xff] %v286_v5  ;;  %v300_v12 = vld [vmem:[%s2680_s29 + $0xc0] sm:$0xff]  ;;  %v302_v13 = vld [vmem:[%s2680_s29 + $0xd0] sm:$0xff] }
  0x2e   : > { %289 = vst [vmem:[%s214_s9 + $0x30] sm:$0xff] %v288_v6  ;;  %v304_v14 = vld [vmem:[%s2680_s29 + $0xe0] sm:$0xff]  ;;  %v306_v15 = vld [vmem:[%s2680_s29 + $0xf0] sm:$0xff] }
  0x2f   : > { %291 = vst [vmem:[%s214_s9 + $0x38] sm:$0xff] %v290_v7 }
  0x30   : > { %293 = vst [vmem:[%s214_s9 + $0x40] sm:$0xff] %v292_v8 }
  0x31   : > { %295 = vst [vmem:[%s214_s9 + $0x48] sm:$0xff] %v294_v9 }
  0x32   : > { %297 = vst [vmem:[%s214_s9 + $0x50] sm:$0xff] %v296_v10 }
  0x33   : > { %299 = vst [vmem:[%s214_s9 + $0x58] sm:$0xff] %v298_v11 }
  0x34   : > { %301 = vst [vmem:[%s214_s9 + $0x60] sm:$0xff] %v300_v12 }
  0x35   : > { %303 = vst [vmem:[%s214_s9 + $0x68] sm:$0xff] %v302_v13 }
  0x36   : > { %305 = vst [vmem:[%s214_s9 + $0x70] sm:$0xff] %v304_v14 }
  0x37   : > { %307 = vst [vmem:[%s214_s9 + $0x78] sm:$0xff] %v306_v15 }
  0x38 PF: > { %p2041_p0 = scmp.ge.s32.totalorder %s2547_s27, 1  ;;  %p329_p1 = scmp.lt.s32.totalorder %s2547_s27, 5 }
  0x3a   : > { %p330_p2 = pnand %p2041_p0, %p329_p1 }
  0x3c   : > { %333 = sbr.rel (%p330_p2) target bundleno = 748 (0x2ec), region = 74 }
  0x41   : > { %s336_s10 = sand.u32 1, %s2523_s21   ;;  %s3585_s12 = sand.u32 1, %s2515_s19  }
  0x42   : > { %s2042_s16 = sshll.u32 %s336_s10, 7  ;;  %s2043_s17 = sshll.u32 %s3585_s12, 8 }
  0x43   : > { %s2044_s28 = sshll.u32 %s2535_s24, 5  ;;  %s2046_s7 = sshll.u32 %s2531_s23, 1 }
  0x44   : > { %p378_p3 = scmp.lt.s32.totalorder %s2044_s28, 63  ;;  %p385_p4 = scmp.lt.s32.totalorder %s2046_s7, 3 }
  0x45   : > { %s2047_s8 = sshll.u32 %s2531_s23, 5  ;;  %s2723_s22 = scalar_lea.vmem [#allocation3], %s2042_s16 }
  0x46   : > { %s3621_s28 = smov (!%p378_p3, %s2044_s28), 63  ;;  %s3623_s7 = smov (!%p385_p4, %s2046_s7), 3 }
  0x47   : > { %s2045_s29 = sshll.u32 %s3621_s28, 3  ;;  %p390_p5 = scmp.lt.s32.totalorder %s2047_s8, 63 }
  0x48   : > { %s2712_s6 = scalar_lea.vmem %s3578_s0, %s2045_s29  ;;  %s387_s12 = scalar_lea.vmem %s3580_s2, %s3623_s7 }
  0x49   : > { %s3625_s8 = smov (!%p390_p5, %s2047_s8), 63  ;;  %s2725_s28 = scalar_lea.vmem [#allocation4], %s2043_s17 }
  0x4a   : > { %s2048_s30 = sshll.u32 %s3625_s8, 2  ;;  %p2049_p6 = scmp.ne.s32.totalorder %s2531_s23, 0 }
  0x4b   : > { %s2721_s11 = scalar_lea.vmem %s3581_s3, %s2048_s30 }
  0x4c   : > { %399 = sbr.rel (%p2049_p6) target bundleno = 114 (0x72), region = 82 }
  0x51   : > { %v2549_v16 = vmov 0.0  }
  0x52   : > { %400 = vst [vmem:[#allocation2 + $0xb0] sm:$0xff] %v2549_v16 }
  0x53   : > { %401 = vst [vmem:[#allocation2] sm:$0xff] %v2549_v16 }
  0x54   : > { %402 = vst [vmem:[#allocation2 + $0xd8] sm:$0xff] %v2549_v16 }
  0x55   : > { %403 = vst [vmem:[#allocation2 + $0x18] sm:$0xff] %v2549_v16 }
  0x56   : > { %404 = vst [vmem:[#allocation2 + $0x50] sm:$0xff] %v2549_v16 }
  0x57   : > { %405 = vst [vmem:[#allocation2 + $0x68] sm:$0xff] %v2549_v16 }
  0x58   : > { %406 = vst [vmem:[#allocation2 + $0x30] sm:$0xff] %v2549_v16 }
  0x59   : > { %407 = vst [vmem:[#allocation2 + $0x48] sm:$0xff] %v2549_v16 }
  0x5a   : > { %408 = vst [vmem:[#allocation2 + $0x80] sm:$0xff] %v2549_v16 }
  0x5b   : > { %409 = vst [vmem:[#allocation2 + $0x88] sm:$0xff] %v2549_v16 }
  0x5c   : > { %410 = vst [vmem:[#allocation2 + $0xe8] sm:$0xff] %v2549_v16 }
  0x5d   : > { %411 = vst [vmem:[#allocation2 + $0xb8] sm:$0xff] %v2549_v16 }
  0x5e   : > { %412 = vst [vmem:[#allocation2 + $0x60] sm:$0xff] %v2549_v16 }
  0x5f   : > { %413 = vst [vmem:[#allocation2 + $0xf0] sm:$0xff] %v2549_v16 }
  0x60   : > { %414 = vst [vmem:[#allocation2 + $0x8] sm:$0xff] %v2549_v16 }
  0x61   : > { %415 = vst [vmem:[#allocation2 + $0x78] sm:$0xff] %v2549_v16 }
  0x62   : > { %416 = vst [vmem:[#allocation2 + $0x38] sm:$0xff] %v2549_v16 }
  0x63   : > { %417 = vst [vmem:[#allocation2 + $0x58] sm:$0xff] %v2549_v16 }
  0x64   : > { %418 = vst [vmem:[#allocation2 + $0x40] sm:$0xff] %v2549_v16 }
  0x65   : > { %419 = vst [vmem:[#allocation2 + $0xc8] sm:$0xff] %v2549_v16 }
  0x66   : > { %420 = vst [vmem:[#allocation2 + $0xe0] sm:$0xff] %v2549_v16 }
  0x67   : > { %421 = vst [vmem:[#allocation2 + $0x90] sm:$0xff] %v2549_v16 }
  0x68   : > { %422 = vst [vmem:[#allocation2 + $0x70] sm:$0xff] %v2549_v16 }
  0x69   : > { %423 = vst [vmem:[#allocation2 + $0xc0] sm:$0xff] %v2549_v16 }
  0x6a   : > { %424 = vst [vmem:[#allocation2 + $0xa8] sm:$0xff] %v2549_v16 }
  0x6b   : > { %425 = vst [vmem:[#allocation2 + $0xd0] sm:$0xff] %v2549_v16 }
  0x6c   : > { %426 = vst [vmem:[#allocation2 + $0x10] sm:$0xff] %v2549_v16 }
  0x6d   : > { %427 = vst [vmem:[#allocation2 + $0x28] sm:$0xff] %v2549_v16 }
  0x6e   : > { %428 = vst [vmem:[#allocation2 + $0xa0] sm:$0xff] %v2549_v16 }
  0x6f   : > { %429 = vst [vmem:[#allocation2 + $0xf8] sm:$0xff] %v2549_v16 }
  0x70   : > { %430 = vst [vmem:[#allocation2 + $0x20] sm:$0xff] %v2549_v16 }
  0x71   : > { %431 = vst [vmem:[#allocation2 + $0x98] sm:$0xff] %v2549_v16 }
  0x72 PF: > { %v2108_v17 = vld [vmem:[%s2723_s22 + $0x70] sm:$0xf]  ;;  %v2200_v18 = vld [vmem:[%s2723_s22 + $0x74] sm:$0xf0]  ;;  %v2199_v19 = vld [vmem:[%s2723_s22 + $0x74] sm:$0xf] }
  0x73   : > { %v2109_v20 = vor.u32 %v2200_v18, %v2108_v17  ;;  %v2110_v21 = vld [vmem:[%s2723_s22 + $0x78] sm:$0xf0]  ;;  %v2100_v22 = vld [vmem:[%s2723_s22 + $0x60] sm:$0xf]  ;;  %v2198_v23 = vld [vmem:[%s2723_s22 + $0x64] sm:$0xf0] }
  0x74   : > { %v2113_v24 = vor.u32 %v2199_v19, %v2110_v21  ;;  %v2197_v25 = vld [vmem:[%s2723_s22 + $0x64] sm:$0xf]  ;;  %v2102_v26 = vld [vmem:[%s2723_s22 + $0x68] sm:$0xf0]  ;;  %v2101_v27 = vor.u32 %v2198_v23, %v2100_v22  ;;  %v2092_v29 = vld [vmem:[%s2723_s22 + $0x50] sm:$0xf] }
  0x75   : > { %582 = vmatpush.bf16.msra.mxu0 %v2109_v20  ;;  %v2105_v28 = vor.u32 %v2197_v25, %v2102_v26  ;;  %v2196_v30 = vld [vmem:[%s2723_s22 + $0x54] sm:$0xf0]  ;;  %v2195_v31 = vld [vmem:[%s2723_s22 + $0x54] sm:$0xf]  ;;  %v2094_v32 = vld [vmem:[%s2723_s22 + $0x58] sm:$0xf0] }
  0x76   : > { %671 = vmatpush.bf16.msra.mxu1 %v2113_v24  ;;  %v2093_v33 = vor.u32 %v2196_v30, %v2092_v29  ;;  %v2097_v34 = vor.u32 %v2195_v31, %v2094_v32  ;;  %v2084_v35 = vld [vmem:[%s2723_s22 + $0x40] sm:$0xf]  ;;  %v2194_v36 = vld [vmem:[%s2723_s22 + $0x44] sm:$0xf0]  ;;  %v2193_v37 = vld [vmem:[%s2723_s22 + $0x44] sm:$0xf] }
  0x77   : > { %v2086_v38 = vld [vmem:[%s2723_s22 + $0x48] sm:$0xf0]  ;;  %v2085_v39 = vor.u32 %v2194_v36, %v2084_v35  ;;  %v2076_v41 = vld [vmem:[%s2723_s22 + $0x30] sm:$0xf]  ;;  %v2192_v42 = vld [vmem:[%s2723_s22 + $0x34] sm:$0xf0] }
  0x78   : > { %v2089_v40 = vor.u32 %v2193_v37, %v2086_v38  ;;  %v2191_v43 = vld [vmem:[%s2723_s22 + $0x34] sm:$0xf]  ;;  %v2078_v44 = vld [vmem:[%s2723_s22 + $0x38] sm:$0xf0]  ;;  %v2077_v45 = vor.u32 %v2192_v42, %v2076_v41  ;;  %v2068_v47 = vld [vmem:[%s2723_s22 + $0x20] sm:$0xf] }
  0x79   : > { %583 = vmatpush.bf16.msra.mxu0 %v2101_v27  ;;  %v2081_v46 = vor.u32 %v2191_v43, %v2078_v44  ;;  %v2190_v48 = vld [vmem:[%s2723_s22 + $0x24] sm:$0xf0]  ;;  %v2189_v49 = vld [vmem:[%s2723_s22 + $0x24] sm:$0xf]  ;;  %v2070_v50 = vld [vmem:[%s2723_s22 + $0x28] sm:$0xf0] }
  0x7a   : > { %672 = vmatpush.bf16.msra.mxu1 %v2105_v28  ;;  %v2069_v51 = vor.u32 %v2190_v48, %v2068_v47  ;;  %v2073_v52 = vor.u32 %v2189_v49, %v2070_v50  ;;  %v2060_v53 = vld [vmem:[%s2723_s22 + $0x10] sm:$0xf]  ;;  %v2188_v54 = vld [vmem:[%s2723_s22 + $0x14] sm:$0xf0]  ;;  %v2187_v55 = vld [vmem:[%s2723_s22 + $0x14] sm:$0xf] }
  0x7b   : > { %v2062_v56 = vld [vmem:[%s2723_s22 + $0x18] sm:$0xf0]  ;;  %v2061_v57 = vor.u32 %v2188_v54, %v2060_v53  ;;  %v2052_v59 = vld [vmem:[%s2723_s22] sm:$0xf]  ;;  %v2186_v60 = vld [vmem:[%s2723_s22 + $0x4] sm:$0xf0] }
  0x7c   : > { %v2065_v58 = vor.u32 %v2187_v55, %v2062_v56  ;;  %v2185_v61 = vld [vmem:[%s2723_s22 + $0x4] sm:$0xf]  ;;  %v2054_v62 = vld [vmem:[%s2723_s22 + $0x8] sm:$0xf0]  ;;  %v2053_v63 = vor.u32 %v2186_v60, %v2052_v59  ;;  %v2769_v4 = vld [vmem:[%s2712_s6 + $0x10] sm:$0xff]  ;;  %p2178_p7 = scmp.ne.s32.totalorder %s2531_s23, 1 }
  0x7d   : > { %584 = vmatpush.bf16.msra.mxu0 %v2093_v33  ;;  %v2761_v0 = vld [vmem:[%s2712_s6] sm:$0xff]  ;;  %v2764_v1 = vld [vmem:[%s2712_s6 + $0x8] sm:$0xff]  ;;  %v2057_v2 = vor.u32 %v2185_v61, %v2054_v62  ;;  %v2772_v5 = vld [vmem:[%s2712_s6 + $0x18] sm:$0xff] }
  0x7e   : > { %673 = vmatpush.bf16.msra.mxu1 %v2097_v34  ;;  %v464_v3 = vpack.c.bf16 %v2764_v1, %v2761_v0  ;;  %v465_v6 = vpack.c.bf16 %v2772_v5, %v2769_v4  ;;  %v2777_v7 = vld [vmem:[%s2712_s6 + $0x20] sm:$0xff]  ;;  %v2780_v8 = vld [vmem:[%s2712_s6 + $0x28] sm:$0xff]  ;;  %v2785_v10 = vld [vmem:[%s2712_s6 + $0x30] sm:$0xff] }
  0x7f   : > { %v466_v9 = vpack.c.bf16 %v2780_v8, %v2777_v7  ;;  %v2788_v11 = vld [vmem:[%s2712_s6 + $0x38] sm:$0xff]  ;;  %v2793_v13 = vld [vmem:[%s2712_s6 + $0x40] sm:$0xff]  ;;  %v2796_v14 = vld [vmem:[%s2712_s6 + $0x48] sm:$0xff] }
  0x80   : > { %v467_v12 = vpack.c.bf16 %v2788_v11, %v2785_v10  ;;  %v468_v15 = vpack.c.bf16 %v2796_v14, %v2793_v13  ;;  %v2801_v16 = vld [vmem:[%s2712_s6 + $0x50] sm:$0xff]  ;;  %v2804_v17 = vld [vmem:[%s2712_s6 + $0x58] sm:$0xff]  ;;  %v2809_v19 = vld [vmem:[%s2712_s6 + $0x60] sm:$0xff] }
  0x81   : > { %585 = vmatpush.bf16.msra.mxu0 %v2085_v39  ;;  %v469_v18 = vpack.c.bf16 %v2804_v17, %v2801_v16  ;;  %v2812_v20 = vld [vmem:[%s2712_s6 + $0x68] sm:$0xff]  ;;  %v2208_v22 = vld [vmem:[%s2721_s11 + $0x38] sm:$0xff]  ;;  %v2207_v24 = vld [vmem:[%s2721_s11 + $0x30] sm:$0xff] }
  0x82   : > { %674 = vmatpush.bf16.msra.mxu1 %v2089_v40  ;;  %v470_v21 = vpack.c.bf16 %v2812_v20, %v2809_v19  ;;  %v2216_v23 = vld [vmem:[%s2721_s11 + $0x78] sm:$0xff]  ;;  %1528 = vmatpush.bf16.msra.mxu2 %v2208_v22  ;;  %v2215_v25 = vld [vmem:[%s2721_s11 + $0x70] sm:$0xff]  ;;  %v2206_v28 = vld [vmem:[%s2721_s11 + $0x28] sm:$0xff] }
  0x83   : > { %1617 = vmatpush.bf16.msra.mxu3 %v2216_v23  ;;  %v2821_v26 = vld [vmem:[%s2712_s6 + $0x70] sm:$0xff]  ;;  %v2824_v27 = vld [vmem:[%s2712_s6 + $0x78] sm:$0xff]  ;;  %v2214_v29 = vld [vmem:[%s2721_s11 + $0x68] sm:$0xff] }
  0x84   : > { %v471_v30 = vpack.c.bf16 %v2824_v27, %v2821_v26  ;;  %v2205_v31 = vld [vmem:[%s2721_s11 + $0x20] sm:$0xff]  ;;  %v2204_v33 = vld [vmem:[%s2721_s11 + $0x18] sm:$0xff]  ;;  %v2203_v35 = vld [vmem:[%s2721_s11 + $0x10] sm:$0xff] }
  0x85   : > { %586 = vmatpush.bf16.msra.mxu0 %v2077_v45  ;;  %v2213_v32 = vld [vmem:[%s2721_s11 + $0x60] sm:$0xff]  ;;  %v2212_v34 = vld [vmem:[%s2721_s11 + $0x58] sm:$0xff]  ;;  %v2211_v36 = vld [vmem:[%s2721_s11 + $0x50] sm:$0xff] }
  0x86   : > { %675 = vmatpush.bf16.msra.mxu1 %v2081_v46  ;;  %1529 = vmatpush.bf16.msra.mxu2 %v2207_v24  ;;  %v496_v37 = vld [vmem:[%s387_s12] sm:$0x3]  ;;  %v2845_v39 = vld [vmem:[%s2712_s6 + $0x88] sm:$0xff] }
  0x87   : > { %1618 = vmatpush.bf16.msra.mxu3 %v2215_v25  ;;  %v2842_v38 = vld [vmem:[%s2712_s6 + $0x80] sm:$0xff]  ;;  %v2202_v40 = vld [vmem:[%s2721_s11 + $0x8] sm:$0xff]  ;;  %v2849_v42 = vperm.slane %v496_v37, 0  ;;  %v2851_v43 = vperm.slane %v496_v37, 1 }
  0x88   : > { %v2210_v41 = vld [vmem:[%s2721_s11 + $0x48] sm:$0xff]  ;;  %v472_v44 = vpack.c.bf16 %v2845_v39, %v2842_v38  ;;  %v2201_v46 = vld [vmem:[%s2721_s11] sm:$0xff] }
  0x89   : > { %587 = vmatpush.bf16.msra.mxu0 %v2069_v51  ;;  %v2209_v47 = vld [vmem:[%s2721_s11 + $0x40] sm:$0xff] }
  0x8a   : > { %676 = vmatpush.bf16.msra.mxu1 %v2073_v52  ;;  %1530 = vmatpush.bf16.msra.mxu2 %v2206_v28 }
  0x8b   : > { %1619 = vmatpush.bf16.msra.mxu3 %v2214_v29 }
  0x8d   : > { %588 = vmatpush.bf16.msra.mxu0 %v2061_v57 }
  0x8e   : > { %677 = vmatpush.bf16.msra.mxu1 %v2065_v58  ;;  %1531 = vmatpush.bf16.msra.mxu2 %v2205_v31 }
  0x8f   : > { %1620 = vmatpush.bf16.msra.mxu3 %v2213_v32 }
  0x91   : > { %589 = vmatpush.bf16.msra.mxu0 %v2053_v63 }
  0x92   : > { %678 = vmatpush.bf16.msra.mxu1 %v2057_v2  ;;  %1532 = vmatpush.bf16.msra.mxu2 %v2204_v33 }
  0x93   : > { %1621 = vmatpush.bf16.msra.mxu3 %v2212_v34 }
  0x94   : > { %590 = vmatmul.bf16.vlgmr.msra.gmra.mxu0 %v464_v3 }
  0x95   : > { %679 = vmatmul.bf16.vlgmr.msra.gmra.mxu1 %v464_v3 }
  0x96   : > { %1533 = vmatpush.bf16.msra.mxu2 %v2203_v35 }
  0x97   : > { %1622 = vmatpush.bf16.msra.mxu3 %v2211_v36 }
  0x9a   : > { %1534 = vmatpush.bf16.msra.mxu2 %v2202_v40 }
  0x9b   : > { %1623 = vmatpush.bf16.msra.mxu3 %v2210_v41 }
  0x9e   : > { %1535 = vmatpush.bf16.msra.mxu2 %v2201_v46 }
  0x9f   : > { %1624 = vmatpush.bf16.msra.mxu3 %v2209_v47 }
  0xa4   : > { %595 = vmatmul.bf16.gmra.mxu0 %v465_v6 }
  0xa5   : > { %684 = vmatmul.bf16.gmra.mxu1 %v465_v6  ;;  %v2882_v6 = vld [vmem:[%s2712_s6 + $0x90] sm:$0xff] }
  0xb4   : > { %600 = vmatmul.bf16.gmra.mxu0 %v466_v9 }
  0xb5   : > { %689 = vmatmul.bf16.gmra.mxu1 %v466_v9  ;;  %v2885_v9 = vld [vmem:[%s2712_s6 + $0x98] sm:$0xff] }
  0xb6   : > { %v473_v22 = vpack.c.bf16 %v2885_v9, %v2882_v6 }
  0xc4   : > { %605 = vmatmul.bf16.gmra.mxu0 %v467_v12 }
  0xc5   : > { %694 = vmatmul.bf16.gmra.mxu1 %v467_v12 }
  0xd4   : > { %610 = vmatmul.bf16.gmra.mxu0 %v468_v15 }
  0xd5   : > { %699 = vmatmul.bf16.gmra.mxu1 %v468_v15 }
  0xe4   : > { %615 = vmatmul.bf16.gmra.mxu0 %v469_v18 }
  0xe5   : > { %704 = vmatmul.bf16.gmra.mxu1 %v469_v18 }
  0xf4   : > { %620 = vmatmul.bf16.gmra.mxu0 %v470_v21 }
  0xf5   : > { %709 = vmatmul.bf16.gmra.mxu1 %v470_v21 }
 0x104   : > { %625 = vmatmul.bf16.gmra.mxu0 %v471_v30 }
 0x105   : > { %714 = vmatmul.bf16.gmra.mxu1 %v471_v30 }
 0x111   : > { %v591_v45 = vpop.f32.mrf.mxu0 }
 0x112   : > { %v2858_v48 = vadd.f32 %v591_v45, %v2849_v42  ;;  %v680_v49 = vpop.f32.mrf.mxu1 }
 0x113   : > { %v2861_v50 = vadd.f32 %v680_v49, %v2851_v43 }
 0x114   : > { %v760_v51 = vmul.f32 %v2858_v48, %v2858_v48  ;;  %630 = vmatmul.bf16.gmra.mxu0 %v472_v44 }
 0x115   : > { %v761_v52 = vmul.f32 %v2861_v50, %v2861_v50  ;;  %719 = vmatmul.bf16.gmra.mxu1 %v472_v44 }
 0x116   : > { %v824_v53 = vmul.f32 %v760_v51, %v2858_v48 }
 0x117   : > { %v825_v54 = vmul.f32 %v761_v52, %v2861_v50 }
 0x118   : > { %v888_v55 = vmul.f32 0.044715, %v824_v53 }
 0x119   : > { %v889_v56 = vmul.f32 0.044715, %v825_v54  ;;  %v593_v57 = vpop.f32.mrf.mxu0 }
 0x11a   : > { %v952_v58 = vadd.f32 %v888_v55, %v2858_v48  ;;  %v2871_v59 = vadd.f32 %v593_v57, %v2849_v42  ;;  %v682_v60 = vpop.f32.mrf.mxu1 }
 0x11b   : > { %v953_v61 = vadd.f32 %v889_v56, %v2861_v50  ;;  %v2875_v62 = vadd.f32 %v682_v60, %v2851_v43 }
 0x11c   : > { %v762_v63 = vmul.f32 %v2871_v59, %v2871_v59  ;;  %v1016_v2 = vmul.f32 0.7978846, %v952_v58 }
 0x11d   : > { %v763_v3 = vmul.f32 %v2875_v62, %v2875_v62  ;;  %v1017_v12 = vmul.f32 0.7978846, %v953_v61 }
 0x11e   : > { %v826_v15 = vmul.f32 %v762_v63, %v2871_v59  ;;  %2308 = vtanh.f32 %v1016_v2  ;;  %v2918_v63 = vld [vmem:[%s2712_s6 + $0xa0] sm:$0xff]  ;;  %v2921_v2 = vld [vmem:[%s2712_s6 + $0xa8] sm:$0xff] }
 0x11f   : > { %v827_v18 = vmul.f32 %v763_v3, %v2875_v62  ;;  %2310 = vtanh.f32 %v1017_v12 }
 0x120   : > { %v890_v21 = vmul.f32 0.044715, %v826_v15 }
 0x121   : > { %v891_v23 = vmul.f32 0.044715, %v827_v18  ;;  %v596_v24 = vpop.f32.mrf.mxu0 }
 0x122   : > { %v2892_v25 = vadd.f32 %v596_v24, %v2849_v42  ;;  %v685_v28 = vpop.f32.mrf.mxu1  ;;  %v954_v29 = vadd.f32 %v890_v21, %v2871_v59 }
 0x123   : > { %v2896_v30 = vadd.f32 %v685_v28, %v2851_v43  ;;  %v955_v31 = vadd.f32 %v891_v23, %v2875_v62 }
 0x124   : > { %v764_v32 = vmul.f32 %v2892_v25, %v2892_v25  ;;  %635 = vmatmul.bf16.gmra.mxu0 %v473_v22  ;;  %v1018_v33 = vmul.f32 0.7978846, %v954_v29  ;;  %v2309_v36 = vpop.eup %2308  ;;  %v474_v29 = vpack.c.bf16 %v2921_v2, %v2918_v63 }
 0x125   : > { %v765_v34 = vmul.f32 %v2896_v30, %v2896_v30  ;;  %724 = vmatmul.bf16.gmra.mxu1 %v473_v22  ;;  %v1019_v35 = vmul.f32 0.7978846, %v955_v31  ;;  %v2311_v40 = vpop.eup %2310  ;;  %v1144_v47 = vadd.f32 1.0, %v2309_v36 }
 0x126   : > { %v828_v37 = vmul.f32 %v764_v32, %v2892_v25  ;;  %2312 = vtanh.f32 %v1018_v33  ;;  %v1145_v53 = vadd.f32 1.0, %v2311_v40 }
 0x127   : > { %v829_v41 = vmul.f32 %v765_v34, %v2896_v30  ;;  %2314 = vtanh.f32 %v1019_v35  ;;  %v1208_v12 = vmul.f32 0.5, %v1144_v47 }
 0x128   : > { %v892_v44 = vmul.f32 0.044715, %v828_v37  ;;  %v1209_v22 = vmul.f32 0.5, %v1145_v53 }
 0x129   : > { %v893_v45 = vmul.f32 0.044715, %v829_v41  ;;  %v598_v46 = vpop.f32.mrf.mxu0  ;;  %v1272_v34 = vmul.f32 %v1208_v12, %v2858_v48 }
 0x12a   : > { %v956_v49 = vadd.f32 %v892_v44, %v2892_v25  ;;  %v2907_v51 = vadd.f32 %v598_v46, %v2849_v42  ;;  %v687_v52 = vpop.f32.mrf.mxu1  ;;  %v1273_v40 = vmul.f32 %v1209_v22, %v2861_v50 }
 0x12b   : > { %v957_v54 = vadd.f32 %v893_v45, %v2896_v30  ;;  %v2911_v55 = vadd.f32 %v687_v52, %v2851_v43 }
 0x12c   : > { %v2313_v56 = vpop.eup %2312  ;;  %v766_v57 = vmul.f32 %v2907_v51, %v2907_v51  ;;  %v1020_v58 = vmul.f32 0.7978846, %v956_v49 }
 0x12d   : > { %v2315_v60 = vpop.eup %2314  ;;  %v767_v61 = vmul.f32 %v2911_v55, %v2911_v55  ;;  %v1146_v3 = vadd.f32 1.0, %v2313_v56  ;;  %v1021_v15 = vmul.f32 0.7978846, %v957_v54 }
 0x12e   : > { %v830_v18 = vmul.f32 %v766_v57, %v2907_v51  ;;  %v1147_v21 = vadd.f32 1.0, %v2315_v60  ;;  %2316 = vtanh.f32 %v1020_v58 }
 0x12f   : > { %v831_v23 = vmul.f32 %v767_v61, %v2911_v55  ;;  %v1210_v24 = vmul.f32 0.5, %v1146_v3  ;;  %2318 = vtanh.f32 %v1021_v15 }
 0x130   : > { %v894_v28 = vmul.f32 0.044715, %v830_v18  ;;  %v1211_v31 = vmul.f32 0.5, %v1147_v21 }
 0x131   : > { %v895_v32 = vmul.f32 0.044715, %v831_v23  ;;  %v601_v33 = vpop.f32.mrf.mxu0  ;;  %v1274_v35 = vmul.f32 %v1210_v24, %v2871_v59 }
 0x132   : > { %v2930_v36 = vadd.f32 %v601_v33, %v2849_v42  ;;  %v690_v37 = vpop.f32.mrf.mxu1  ;;  %v1275_v41 = vmul.f32 %v1211_v31, %v2875_v62  ;;  %v958_v44 = vadd.f32 %v894_v28, %v2907_v51  ;;  %v2961_v33 = vld [vmem:[%s2712_s6 + $0xb8] sm:$0xff] }
 0x133   : > { %v2936_v45 = vadd.f32 %v690_v37, %v2851_v43  ;;  %v1368_v46 = vpack.c.bf16 %v1274_v35, %v1272_v34  ;;  %v959_v47 = vadd.f32 %v895_v32, %v2911_v55  ;;  %v2958_v32 = vld [vmem:[%s2712_s6 + $0xb0] sm:$0xff] }
 0x134   : > { %v768_v48 = vmul.f32 %v2930_v36, %v2930_v36  ;;  %640 = vmatmul.bf16.gmra.mxu0 %v474_v29  ;;  %v1369_v59 = vpack.c.bf16 %v1275_v41, %v1273_v40  ;;  %v1022_v49 = vmul.f32 0.7978846, %v958_v44  ;;  %v2317_v62 = vpop.eup %2316 }
 0x135   : > { %v769_v52 = vmul.f32 %v2936_v45, %v2936_v45  ;;  %729 = vmatmul.bf16.gmra.mxu1 %v474_v29  ;;  %1536 = vmatmul.bf16.vlgmr.msra.gmra.mxu2 %v1368_v46  ;;  %v1023_v50 = vmul.f32 0.7978846, %v959_v47  ;;  %v2319_v54 = vpop.eup %2318  ;;  %v1148_v61 = vadd.f32 1.0, %v2317_v62 }
 0x136   : > { %v832_v53 = vmul.f32 %v768_v48, %v2930_v36  ;;  %1625 = vmatmul.bf16.vlgmr.msra.gmra.mxu3 %v1369_v59  ;;  %2320 = vtanh.f32 %v1022_v49  ;;  %v1149_v18 = vadd.f32 1.0, %v2319_v54  ;;  %v475_v59 = vpack.c.bf16 %v2961_v33, %v2958_v32 }
 0x137   : > { %v833_v56 = vmul.f32 %v769_v52, %v2936_v45  ;;  %2322 = vtanh.f32 %v1023_v50  ;;  %v1212_v35 = vmul.f32 0.5, %v1148_v61 }
 0x138   : > { %v896_v57 = vmul.f32 0.044715, %v832_v53  ;;  %v1213_v44 = vmul.f32 0.5, %v1149_v18 }
 0x139   : > { %v897_v58 = vmul.f32 0.044715, %v833_v56  ;;  %v603_v60 = vpop.f32.mrf.mxu0  ;;  %v1276_v62 = vmul.f32 %v1212_v35, %v2892_v25 }
 0x13a   : > { %v960_v3 = vadd.f32 %v896_v57, %v2930_v36  ;;  %v2947_v12 = vadd.f32 %v603_v60, %v2849_v42  ;;  %v692_v15 = vpop.f32.mrf.mxu1  ;;  %v1277_v57 = vmul.f32 %v1213_v44, %v2896_v30 }
 0x13b   : > { %v961_v21 = vadd.f32 %v897_v58, %v2936_v45  ;;  %v2951_v22 = vadd.f32 %v692_v15, %v2851_v43 }
 0x13c   : > { %v2321_v23 = vpop.eup %2320  ;;  %v770_v24 = vmul.f32 %v2947_v12, %v2947_v12  ;;  %v1024_v28 = vmul.f32 0.7978846, %v960_v3 }
 0x13d   : > { %v2323_v29 = vpop.eup %2322  ;;  %v771_v31 = vmul.f32 %v2951_v22, %v2951_v22  ;;  %v1150_v34 = vadd.f32 1.0, %v2321_v23  ;;  %v1025_v37 = vmul.f32 0.7978846, %v961_v21 }
 0x13e   : > { %v834_v40 = vmul.f32 %v770_v24, %v2947_v12  ;;  %v1151_v41 = vadd.f32 1.0, %v2323_v29  ;;  %2324 = vtanh.f32 %v1024_v28 }
 0x13f   : > { %v835_v46 = vmul.f32 %v771_v31, %v2951_v22  ;;  %v1214_v47 = vmul.f32 0.5, %v1150_v34  ;;  %2326 = vtanh.f32 %v1025_v37 }
 0x140   : > { %v898_v48 = vmul.f32 0.044715, %v834_v40  ;;  %v1215_v49 = vmul.f32 0.5, %v1151_v41 }
 0x141   : > { %v899_v52 = vmul.f32 0.044715, %v835_v46  ;;  %v606_v50 = vpop.f32.mrf.mxu0  ;;  %v1278_v53 = vmul.f32 %v1214_v47, %v2907_v51 }
 0x142   : > { %v2970_v54 = vadd.f32 %v606_v50, %v2849_v42  ;;  %v695_v56 = vpop.f32.mrf.mxu1  ;;  %v1279_v58 = vmul.f32 %v1215_v49, %v2911_v55  ;;  %v962_v60 = vadd.f32 %v898_v48, %v2947_v12 }
 0x143   : > { %v2976_v61 = vadd.f32 %v695_v56, %v2851_v43  ;;  %v1370_v3 = vpack.c.bf16 %v1278_v53, %v1276_v62  ;;  %v963_v15 = vadd.f32 %v899_v52, %v2951_v22  ;;  %v2998_v62 = vld [vmem:[%s2712_s6 + $0xc0] sm:$0xff]  ;;  %v3001_v53 = vld [vmem:[%s2712_s6 + $0xc8] sm:$0xff] }
 0x144   : > { %v772_v25 = vmul.f32 %v2970_v54, %v2970_v54  ;;  %645 = vmatmul.bf16.gmra.mxu0 %v475_v59  ;;  %v1371_v51 = vpack.c.bf16 %v1279_v58, %v1277_v57  ;;  %v1026_v18 = vmul.f32 0.7978846, %v962_v60  ;;  %v2325_v55 = vpop.eup %2324 }
 0x145   : > { %v773_v21 = vmul.f32 %v2976_v61, %v2976_v61  ;;  %734 = vmatmul.bf16.gmra.mxu1 %v475_v59  ;;  %1541 = vmatmul.bf16.gmra.mxu2 %v1370_v3  ;;  %v1027_v30 = vmul.f32 0.7978846, %v963_v15  ;;  %v2327_v24 = vpop.eup %2326  ;;  %v1152_v35 = vadd.f32 1.0, %v2325_v55 }
 0x146   : > { %v836_v23 = vmul.f32 %v772_v25, %v2970_v54  ;;  %1630 = vmatmul.bf16.gmra.mxu3 %v1371_v51  ;;  %2328 = vtanh.f32 %v1026_v18  ;;  %v1153_v44 = vadd.f32 1.0, %v2327_v24 }
 0x147   : > { %v837_v28 = vmul.f32 %v773_v21, %v2976_v61  ;;  %2330 = vtanh.f32 %v1027_v30  ;;  %v1216_v57 = vmul.f32 0.5, %v1152_v35  ;;  %v476_v21 = vpack.c.bf16 %v3001_v53, %v2998_v62 }
 0x148   : > { %v900_v29 = vmul.f32 0.044715, %v836_v23  ;;  %v1217_v15 = vmul.f32 0.5, %v1153_v44 }
 0x149   : > { %v901_v31 = vmul.f32 0.044715, %v837_v28  ;;  %v608_v34 = vpop.f32.mrf.mxu0  ;;  %v1280_v24 = vmul.f32 %v1216_v57, %v2930_v36 }
 0x14a   : > { %v964_v37 = vadd.f32 %v900_v29, %v2970_v54  ;;  %v2987_v40 = vadd.f32 %v608_v34, %v2849_v42  ;;  %v697_v41 = vpop.f32.mrf.mxu1  ;;  %v1281_v34 = vmul.f32 %v1217_v15, %v2936_v45 }
 0x14b   : > { %v965_v46 = vadd.f32 %v901_v31, %v2976_v61  ;;  %v2991_v47 = vadd.f32 %v697_v41, %v2851_v43 }
 0x14c   : > { %v2329_v48 = vpop.eup %2328  ;;  %v774_v59 = vmul.f32 %v2987_v40, %v2987_v40  ;;  %v1028_v49 = vmul.f32 0.7978846, %v964_v37 }
 0x14d   : > { %v2331_v52 = vpop.eup %2330  ;;  %v775_v50 = vmul.f32 %v2991_v47, %v2991_v47  ;;  %v1154_v56 = vadd.f32 1.0, %v2329_v48  ;;  %v1029_v58 = vmul.f32 0.7978846, %v965_v46 }
 0x14e   : > { %v838_v60 = vmul.f32 %v774_v59, %v2987_v40  ;;  %v1155_v3 = vadd.f32 1.0, %v2331_v52  ;;  %2332 = vtanh.f32 %v1028_v49 }
 0x14f   : > { %v839_v25 = vmul.f32 %v775_v50, %v2991_v47  ;;  %v1218_v51 = vmul.f32 0.5, %v1154_v56  ;;  %2334 = vtanh.f32 %v1029_v58 }
 0x150   : > { %v902_v18 = vmul.f32 0.044715, %v838_v60  ;;  %v1219_v30 = vmul.f32 0.5, %v1155_v3 }
 0x151   : > { %v903_v55 = vmul.f32 0.044715, %v839_v25  ;;  %v611_v23 = vpop.f32.mrf.mxu0  ;;  %v1282_v28 = vmul.f32 %v1218_v51, %v2947_v12 }
 0x152   : > { %v3010_v29 = vadd.f32 %v611_v23, %v2849_v42  ;;  %v700_v31 = vpop.f32.mrf.mxu1  ;;  %v1283_v35 = vmul.f32 %v1219_v30, %v2951_v22  ;;  %v966_v37 = vadd.f32 %v902_v18, %v2987_v40 }
 0x153   : > { %v3016_v41 = vadd.f32 %v700_v31, %v2851_v43  ;;  %v1372_v44 = vpack.c.bf16 %v1282_v28, %v1280_v24  ;;  %v967_v46 = vadd.f32 %v903_v55, %v2991_v47  ;;  %v3038_v31 = vld [vmem:[%s2712_s6 + $0xd0] sm:$0xff] }
 0x154   : > { %v776_v36 = vmul.f32 %v3010_v29, %v3010_v29  ;;  %650 = vmatmul.bf16.gmra.mxu0 %v476_v21  ;;  %v1373_v12 = vpack.c.bf16 %v1283_v35, %v1281_v34  ;;  %v1030_v48 = vmul.f32 0.7978846, %v966_v37  ;;  %v2333_v22 = vpop.eup %2332  ;;  %v3041_v34 = vld [vmem:[%s2712_s6 + $0xd8] sm:$0xff] }
 0x155   : > { %v777_v59 = vmul.f32 %v3016_v41, %v3016_v41  ;;  %739 = vmatmul.bf16.gmra.mxu1 %v476_v21  ;;  %1546 = vmatmul.bf16.gmra.mxu2 %v1372_v44  ;;  %v1031_v45 = vmul.f32 0.7978846, %v967_v46  ;;  %v2335_v52 = vpop.eup %2334  ;;  %v1156_v60 = vadd.f32 1.0, %v2333_v22  ;;  %v477_v22 = vpack.c.bf16 %v3041_v34, %v3038_v31 }
 0x156   : > { %v840_v49 = vmul.f32 %v776_v36, %v3010_v29  ;;  %1635 = vmatmul.bf16.gmra.mxu3 %v1373_v12  ;;  %2336 = vtanh.f32 %v1030_v48  ;;  %v1157_v51 = vadd.f32 1.0, %v2335_v52 }
 0x157   : > { %v841_v50 = vmul.f32 %v777_v59, %v3016_v41  ;;  %2338 = vtanh.f32 %v1031_v45  ;;  %v1220_v37 = vmul.f32 0.5, %v1156_v60 }
 0x158   : > { %v904_v56 = vmul.f32 0.044715, %v840_v49  ;;  %v1221_v12 = vmul.f32 0.5, %v1157_v51 }
 0x159   : > { %v905_v57 = vmul.f32 0.044715, %v841_v50  ;;  %v613_v58 = vpop.f32.mrf.mxu0 }
 0x15a   : > { %v968_v3 = vadd.f32 %v904_v56, %v3010_v29  ;;  %v3027_v15 = vadd.f32 %v613_v58, %v2849_v42  ;;  %v702_v25 = vpop.f32.mrf.mxu1  ;;  %v1284_v56 = vmul.f32 %v1220_v37, %v2970_v54 }
 0x15b   : > { %v969_v18 = vadd.f32 %v905_v57, %v3016_v41  ;;  %v3031_v21 = vadd.f32 %v702_v25, %v2851_v43  ;;  %v1285_v25 = vmul.f32 %v1221_v12, %v2976_v61 }
 0x15c   : > { %v2337_v30 = vpop.eup %2336  ;;  %v778_v55 = vmul.f32 %v3027_v15, %v3027_v15  ;;  %v1032_v23 = vmul.f32 0.7978846, %v968_v3 }
 0x15d   : > { %v2339_v24 = vpop.eup %2338  ;;  %v779_v28 = vmul.f32 %v3031_v21, %v3031_v21  ;;  %v1158_v35 = vadd.f32 1.0, %v2337_v30  ;;  %v1033_v44 = vmul.f32 0.7978846, %v969_v18 }
 0x15e   : > { %v842_v46 = vmul.f32 %v778_v55, %v3027_v15  ;;  %v1159_v36 = vadd.f32 1.0, %v2339_v24  ;;  %2340 = vtanh.f32 %v1032_v23 }
 0x15f   : > { %v843_v48 = vmul.f32 %v779_v28, %v3031_v21  ;;  %v1222_v59 = vmul.f32 0.5, %v1158_v35  ;;  %2342 = vtanh.f32 %v1033_v44 }
 0x160   : > { %v906_v45 = vmul.f32 0.044715, %v842_v46  ;;  %v1223_v49 = vmul.f32 0.5, %v1159_v36 }
 0x161   : > { %v907_v52 = vmul.f32 0.044715, %v843_v48  ;;  %v616_v50 = vpop.f32.mrf.mxu0  ;;  %v1286_v57 = vmul.f32 %v1222_v59, %v2987_v40 }
 0x162   : > { %v970_v58 = vadd.f32 %v906_v45, %v3027_v15  ;;  %v3051_v60 = vadd.f32 %v616_v50, %v2849_v42  ;;  %v705_v3 = vpop.f32.mrf.mxu1  ;;  %v1287_v51 = vmul.f32 %v1223_v49, %v2991_v47 }
 0x163   : > { %v971_v18 = vadd.f32 %v907_v52, %v3031_v21  ;;  %v3057_v30 = vadd.f32 %v705_v3, %v2851_v43  ;;  %v1374_v55 = vpack.c.bf16 %v1286_v57, %v1284_v56 }
 0x164   : > { %v780_v54 = vmul.f32 %v3051_v60, %v3051_v60  ;;  %655 = vmatmul.bf16.gmra.mxu0 %v477_v22  ;;  %v1375_v40 = vpack.c.bf16 %v1287_v51, %v1285_v25  ;;  %v1034_v23 = vmul.f32 0.7978846, %v970_v58  ;;  %v2341_v28 = vpop.eup %2340  ;;  %v3078_v25 = vld [vmem:[%s2712_s6 + $0xe0] sm:$0xff]  ;;  %v3081_v51 = vld [vmem:[%s2712_s6 + $0xe8] sm:$0xff] }
 0x165   : > { %v781_v24 = vmul.f32 %v3057_v30, %v3057_v30  ;;  %744 = vmatmul.bf16.gmra.mxu1 %v477_v22  ;;  %1551 = vmatmul.bf16.gmra.mxu2 %v1374_v55  ;;  %v1035_v61 = vmul.f32 0.7978846, %v971_v18  ;;  %v2343_v35 = vpop.eup %2342  ;;  %v1160_v12 = vadd.f32 1.0, %v2341_v28 }
 0x166   : > { %v844_v47 = vmul.f32 %v780_v54, %v3051_v60  ;;  %1640 = vmatmul.bf16.gmra.mxu3 %v1375_v40  ;;  %2344 = vtanh.f32 %v1034_v23  ;;  %v1161_v22 = vadd.f32 1.0, %v2343_v35  ;;  %v478_v35 = vpack.c.bf16 %v3081_v51, %v3078_v25 }
 0x167   : > { %v845_v37 = vmul.f32 %v781_v24, %v3057_v30  ;;  %2346 = vtanh.f32 %v1035_v61  ;;  %v1224_v55 = vmul.f32 0.5, %v1160_v12 }
 0x168   : > { %v908_v44 = vmul.f32 0.044715, %v844_v47  ;;  %v1225_v24 = vmul.f32 0.5, %v1161_v22 }
 0x169   : > { %v909_v46 = vmul.f32 0.044715, %v845_v37  ;;  %v618_v36 = vpop.f32.mrf.mxu0 }
 0x16a   : > { %v972_v48 = vadd.f32 %v908_v44, %v3051_v60  ;;  %v3067_v59 = vadd.f32 %v618_v36, %v2849_v42  ;;  %v707_v45 = vpop.f32.mrf.mxu1  ;;  %v1288_v36 = vmul.f32 %v1224_v55, %v3010_v29 }
 0x16b   : > { %v973_v49 = vadd.f32 %v909_v46, %v3057_v30  ;;  %v3071_v52 = vadd.f32 %v707_v45, %v2851_v43 }
 0x16c   : > { %v2345_v50 = vpop.eup %2344  ;;  %v782_v56 = vmul.f32 %v3067_v59, %v3067_v59  ;;  %v1036_v57 = vmul.f32 0.7978846, %v972_v48 }
 0x16d   : > { %v2347_v58 = vpop.eup %2346  ;;  %v783_v3 = vmul.f32 %v3071_v52, %v3071_v52  ;;  %v1162_v18 = vadd.f32 1.0, %v2345_v50  ;;  %v1037_v54 = vmul.f32 0.7978846, %v973_v49  ;;  %v1289_v49 = vmul.f32 %v1225_v24, %v3016_v41 }
 0x16e   : > { %v846_v40 = vmul.f32 %v782_v56, %v3067_v59  ;;  %v1163_v23 = vadd.f32 1.0, %v2347_v58  ;;  %2348 = vtanh.f32 %v1036_v57 }
 0x16f   : > { %v847_v61 = vmul.f32 %v783_v3, %v3071_v52  ;;  %v1226_v28 = vmul.f32 0.5, %v1162_v18  ;;  %2350 = vtanh.f32 %v1037_v54 }
 0x170   : > { %v910_v47 = vmul.f32 0.044715, %v846_v40  ;;  %v1227_v37 = vmul.f32 0.5, %v1163_v23 }
 0x171   : > { %v911_v44 = vmul.f32 0.044715, %v847_v61  ;;  %v621_v46 = vpop.f32.mrf.mxu0  ;;  %v1290_v12 = vmul.f32 %v1226_v28, %v3027_v15 }
 0x172   : > { %v974_v48 = vadd.f32 %v910_v47, %v3067_v59  ;;  %v3091_v45 = vadd.f32 %v621_v46, %v2849_v42  ;;  %v710_v22 = vpop.f32.mrf.mxu1  ;;  %v1291_v50 = vmul.f32 %v1227_v37, %v3031_v21 }
 0x173   : > { %v975_v56 = vadd.f32 %v911_v44, %v3071_v52  ;;  %v3097_v57 = vadd.f32 %v710_v22, %v2851_v43  ;;  %v1376_v58 = vpack.c.bf16 %v1290_v12, %v1288_v36 }
 0x174   : > { %v784_v29 = vmul.f32 %v3091_v45, %v3091_v45  ;;  %660 = vmatmul.bf16.gmra.mxu0 %v478_v35  ;;  %v1377_v15 = vpack.c.bf16 %v1291_v50, %v1289_v49  ;;  %v1038_v3 = vmul.f32 0.7978846, %v974_v48  ;;  %v2349_v55 = vpop.eup %2348 }
 0x175   : > { %v785_v18 = vmul.f32 %v3097_v57, %v3097_v57  ;;  %749 = vmatmul.bf16.gmra.mxu1 %v478_v35  ;;  %1556 = vmatmul.bf16.gmra.mxu2 %v1376_v58  ;;  %v1039_v41 = vmul.f32 0.7978846, %v975_v56  ;;  %v2351_v54 = vpop.eup %2350  ;;  %v1164_v28 = vadd.f32 1.0, %v2349_v55  ;;  %v3118_v56 = vld [vmem:[%s2712_s6 + $0xf0] sm:$0xff]  ;;  %v3121_v58 = vld [vmem:[%s2712_s6 + $0xf8] sm:$0xff] }
 0x176   : > { %v848_v21 = vmul.f32 %v784_v29, %v3091_v45  ;;  %1645 = vmatmul.bf16.gmra.mxu3 %v1377_v15  ;;  %2352 = vtanh.f32 %v1038_v3  ;;  %v1165_v44 = vadd.f32 1.0, %v2351_v54  ;;  %3602 = vst [vmem:[#allocation13_spill] sm:$0xff] %v3121_v58 }
 0x177   : > { %v849_v40 = vmul.f32 %v785_v18, %v3097_v57  ;;  %2354 = vtanh.f32 %v1039_v41  ;;  %v1228_v15 = vmul.f32 0.5, %v1164_v28 }
 0x178   : > { %v912_v23 = vmul.f32 0.044715, %v848_v21  ;;  %v1229_v55 = vmul.f32 0.5, %v1165_v44 }
 0x179   : > { %v913_v24 = vmul.f32 0.044715, %v849_v40  ;;  %v623_v61 = vpop.f32.mrf.mxu0 }
 0x17a   : > { %v976_v47 = vadd.f32 %v912_v23, %v3091_v45  ;;  %v3107_v35 = vadd.f32 %v623_v61, %v2849_v42  ;;  %v712_v37 = vpop.f32.mrf.mxu1  ;;  %v479_v23 = vpack.c.bf16 %v3121_v58, %v3118_v56 }
 0x17b   : > { %v977_v46 = vadd.f32 %v913_v24, %v3097_v57  ;;  %v3111_v36 = vadd.f32 %v712_v37, %v2851_v43  ;;  %v1292_v37 = vmul.f32 %v1228_v15, %v3051_v60 }
 0x17c   : > { %v2353_v12 = vpop.eup %2352  ;;  %v786_v48 = vmul.f32 %v3107_v35, %v3107_v35  ;;  %v1040_v22 = vmul.f32 0.7978846, %v976_v47 }
 0x17d   : > { %v2355_v49 = vpop.eup %2354  ;;  %v787_v50 = vmul.f32 %v3111_v36, %v3111_v36  ;;  %v1166_v29 = vadd.f32 1.0, %v2353_v12  ;;  %v1041_v3 = vmul.f32 0.7978846, %v977_v46 }
 0x17e   : > { %v850_v18 = vmul.f32 %v786_v48, %v3107_v35  ;;  %v1167_v41 = vadd.f32 1.0, %v2355_v49  ;;  %2356 = vtanh.f32 %v1040_v22  ;;  %v1293_v48 = vmul.f32 %v1229_v55, %v3057_v30 }
 0x17f   : > { %v851_v21 = vmul.f32 %v787_v50, %v3111_v36  ;;  %v1230_v54 = vmul.f32 0.5, %v1166_v29  ;;  %2358 = vtanh.f32 %v1041_v3 }
 0x180   : > { %v914_v40 = vmul.f32 0.044715, %v850_v18  ;;  %v1231_v24 = vmul.f32 0.5, %v1167_v41 }
 0x181   : > { %v915_v61 = vmul.f32 0.044715, %v851_v21  ;;  %v626_v47 = vpop.f32.mrf.mxu0  ;;  %v1294_v28 = vmul.f32 %v1230_v54, %v3067_v59 }
 0x182   : > { %v978_v46 = vadd.f32 %v914_v40, %v3107_v35  ;;  %v3131_v44 = vadd.f32 %v626_v47, %v2849_v42  ;;  %v715_v12 = vpop.f32.mrf.mxu1  ;;  %v1295_v49 = vmul.f32 %v1231_v24, %v3071_v52 }
 0x183   : > { %v979_v50 = vadd.f32 %v915_v61, %v3111_v36  ;;  %v3137_v22 = vadd.f32 %v715_v12, %v2851_v43  ;;  %v1378_v29 = vpack.c.bf16 %v1294_v28, %v1292_v37 }
 0x184   : > { %v788_v60 = vmul.f32 %v3131_v44, %v3131_v44  ;;  %665 = vmatmul.bf16.gmra.mxu0 %v479_v23  ;;  %v1379_v59 = vpack.c.bf16 %v1295_v49, %v1293_v48  ;;  %v1042_v15 = vmul.f32 0.7978846, %v978_v46  ;;  %v2357_v18 = vpop.eup %2356 }
 0x185   : > { %v789_v3 = vmul.f32 %v3137_v22, %v3137_v22  ;;  %754 = vmatmul.bf16.gmra.mxu1 %v479_v23  ;;  %1561 = vmatmul.bf16.gmra.mxu2 %v1378_v29  ;;  %v1043_v30 = vmul.f32 0.7978846, %v979_v50  ;;  %v2359_v41 = vpop.eup %2358  ;;  %v1168_v24 = vadd.f32 1.0, %v2357_v18 }
 0x186   : > { %v852_v52 = vmul.f32 %v788_v60, %v3131_v44  ;;  %1650 = vmatmul.bf16.gmra.mxu3 %v1379_v59  ;;  %2360 = vtanh.f32 %v1042_v15  ;;  %v1169_v37 = vadd.f32 1.0, %v2359_v41 }
 0x187   : > { %v853_v55 = vmul.f32 %v789_v3, %v3137_v22  ;;  %2362 = vtanh.f32 %v1043_v30  ;;  %v1232_v59 = vmul.f32 0.5, %v1168_v24 }
 0x188   : > { %v916_v21 = vmul.f32 0.044715, %v852_v52  ;;  %v1233_v18 = vmul.f32 0.5, %v1169_v37 }
 0x189   : > { %v917_v54 = vmul.f32 0.044715, %v853_v55  ;;  %v628_v40 = vpop.f32.mrf.mxu0 }
 0x18a   : > { %v980_v61 = vadd.f32 %v916_v21, %v3131_v44  ;;  %v3147_v47 = vadd.f32 %v628_v40, %v2849_v42  ;;  %v717_v23 = vpop.f32.mrf.mxu1  ;;  %v1297_v37 = vmul.f32 %v1233_v18, %v3097_v57 }
 0x18b   : > { %v981_v28 = vadd.f32 %v917_v54, %v3137_v22  ;;  %v3151_v46 = vadd.f32 %v717_v23, %v2851_v43 }
 0x18c   : > { %v2361_v12 = vpop.eup %2360  ;;  %v790_v48 = vmul.f32 %v3147_v47, %v3147_v47  ;;  %v1044_v49 = vmul.f32 0.7978846, %v980_v61  ;;  %v1296_v61 = vmul.f32 %v1232_v59, %v3091_v45 }
 0x18d   : > { %v2363_v50 = vpop.eup %2362  ;;  %v791_v29 = vmul.f32 %v3151_v46, %v3151_v46  ;;  %v1170_v60 = vadd.f32 1.0, %v2361_v12  ;;  %v1045_v15 = vmul.f32 0.7978846, %v981_v28 }
 0x18e   : > { %v854_v3 = vmul.f32 %v790_v48, %v3147_v47  ;;  %v1171_v30 = vadd.f32 1.0, %v2363_v50  ;;  %2364 = vtanh.f32 %v1044_v49 }
 0x18f   : > { %v855_v52 = vmul.f32 %v791_v29, %v3151_v46  ;;  %v1234_v41 = vmul.f32 0.5, %v1170_v60  ;;  %2366 = vtanh.f32 %v1045_v15 }
 0x190   : > { %v918_v55 = vmul.f32 0.044715, %v854_v3  ;;  %v1235_v21 = vmul.f32 0.5, %v1171_v30 }
 0x191   : > { %v919_v54 = vmul.f32 0.044715, %v855_v52  ;;  %v631_v40 = vpop.f32.mrf.mxu0  ;;  %v1298_v23 = vmul.f32 %v1234_v41, %v3107_v35 }
 0x192   : > { %v982_v24 = vadd.f32 %v918_v55, %v3147_v47  ;;  %v3163_v28 = vadd.f32 %v631_v40, %v2849_v42  ;;  %v720_v12 = vpop.f32.mrf.mxu1  ;;  %v1299_v48 = vmul.f32 %v1235_v21, %v3111_v36 }
 0x193   : > { %v983_v50 = vadd.f32 %v919_v54, %v3151_v46  ;;  %v3169_v49 = vadd.f32 %v720_v12, %v2851_v43  ;;  %v1380_v29 = vpack.c.bf16 %v1298_v23, %v1296_v61 }
 0x194   : > { %v792_v45 = vmul.f32 %v3163_v28, %v3163_v28  ;;  %v1381_v35 = vpack.c.bf16 %v1299_v48, %v1297_v37  ;;  %v1046_v60 = vmul.f32 0.7978846, %v982_v24  ;;  %v2365_v3 = vpop.eup %2364 }
 0x195   : > { %v793_v59 = vmul.f32 %v3169_v49, %v3169_v49  ;;  %1566 = vmatmul.bf16.gmra.mxu2 %v1380_v29  ;;  %v1047_v15 = vmul.f32 0.7978846, %v983_v50  ;;  %v2367_v36 = vpop.eup %2366  ;;  %v1172_v55 = vadd.f32 1.0, %v2365_v3 }
 0x196   : > { %v856_v57 = vmul.f32 %v792_v45, %v3163_v28  ;;  %1655 = vmatmul.bf16.gmra.mxu3 %v1381_v35  ;;  %2368 = vtanh.f32 %v1046_v60  ;;  %v1173_v61 = vadd.f32 1.0, %v2367_v36 }
 0x197   : > { %v857_v30 = vmul.f32 %v793_v59, %v3169_v49  ;;  %2370 = vtanh.f32 %v1047_v15  ;;  %v1236_v35 = vmul.f32 0.5, %v1172_v55 }
 0x198   : > { %v920_v18 = vmul.f32 0.044715, %v856_v57  ;;  %v1237_v3 = vmul.f32 0.5, %v1173_v61 }
 0x199   : > { %v921_v52 = vmul.f32 0.044715, %v857_v30  ;;  %v633_v41 = vpop.f32.mrf.mxu0 }
 0x19a   : > { %v984_v21 = vadd.f32 %v920_v18, %v3163_v28  ;;  %v3179_v54 = vadd.f32 %v633_v41, %v2849_v42  ;;  %v722_v40 = vpop.f32.mrf.mxu1  ;;  %v1301_v61 = vmul.f32 %v1237_v3, %v3137_v22 }
 0x19b   : > { %v985_v23 = vadd.f32 %v921_v52, %v3169_v49  ;;  %v3183_v24 = vadd.f32 %v722_v40, %v2851_v43 }
 0x19c   : > { %v2369_v12 = vpop.eup %2368  ;;  %v794_v37 = vmul.f32 %v3179_v54, %v3179_v54  ;;  %v1048_v48 = vmul.f32 0.7978846, %v984_v21  ;;  %v1300_v21 = vmul.f32 %v1236_v35, %v3131_v44 }
 0x19d   : > { %v2371_v50 = vpop.eup %2370  ;;  %v795_v29 = vmul.f32 %v3183_v24, %v3183_v24  ;;  %v1174_v45 = vadd.f32 1.0, %v2369_v12  ;;  %v1049_v60 = vmul.f32 0.7978846, %v985_v23 }
 0x19e   : > { %v858_v59 = vmul.f32 %v794_v37, %v3179_v54  ;;  %v1175_v15 = vadd.f32 1.0, %v2371_v50  ;;  %2372 = vtanh.f32 %v1048_v48 }
 0x19f   : > { %v859_v57 = vmul.f32 %v795_v29, %v3183_v24  ;;  %v1238_v36 = vmul.f32 0.5, %v1174_v45  ;;  %2374 = vtanh.f32 %v1049_v60 }
 0x1a0   : > { %v922_v30 = vmul.f32 0.044715, %v858_v59  ;;  %v1239_v18 = vmul.f32 0.5, %v1175_v15 }
 0x1a1   : > { %v923_v52 = vmul.f32 0.044715, %v859_v57  ;;  %v636_v41 = vpop.f32.mrf.mxu0  ;;  %v1302_v40 = vmul.f32 %v1238_v36, %v3147_v47 }
 0x1a2   : > { %v986_v55 = vadd.f32 %v922_v30, %v3179_v54  ;;  %v3195_v23 = vadd.f32 %v636_v41, %v2849_v42  ;;  %v725_v12 = vpop.f32.mrf.mxu1  ;;  %v1303_v37 = vmul.f32 %v1239_v18, %v3151_v46 }
 0x1a3   : > { %v987_v50 = vadd.f32 %v923_v52, %v3183_v24  ;;  %v3201_v48 = vadd.f32 %v725_v12, %v2851_v43  ;;  %v1382_v29 = vpack.c.bf16 %v1302_v40, %v1300_v21 }
 0x1a4   : > { %v796_v44 = vmul.f32 %v3195_v23, %v3195_v23  ;;  %v1383_v47 = vpack.c.bf16 %v1303_v37, %v1301_v61  ;;  %v1050_v45 = vmul.f32 0.7978846, %v986_v55  ;;  %v2373_v59 = vpop.eup %2372 }
 0x1a5   : > { %v797_v35 = vmul.f32 %v3201_v48, %v3201_v48  ;;  %1571 = vmatmul.bf16.gmra.mxu2 %v1382_v29  ;;  %v1051_v60 = vmul.f32 0.7978846, %v987_v50  ;;  %v2375_v46 = vpop.eup %2374  ;;  %v1176_v30 = vadd.f32 1.0, %v2373_v59 }
 0x1a6   : > { %v860_v22 = vmul.f32 %v796_v44, %v3195_v23  ;;  %1660 = vmatmul.bf16.gmra.mxu3 %v1383_v47  ;;  %2376 = vtanh.f32 %v1050_v45  ;;  %v1177_v21 = vadd.f32 1.0, %v2375_v46 }
 0x1a7   : > { %v861_v15 = vmul.f32 %v797_v35, %v3201_v48  ;;  %2378 = vtanh.f32 %v1051_v60  ;;  %v1240_v47 = vmul.f32 0.5, %v1176_v30 }
 0x1a8   : > { %v924_v3 = vmul.f32 0.044715, %v860_v22  ;;  %v1241_v59 = vmul.f32 0.5, %v1177_v21 }
 0x1a9   : > { %v925_v57 = vmul.f32 0.044715, %v861_v15  ;;  %v638_v36 = vpop.f32.mrf.mxu0 }
 0x1aa   : > { %v988_v18 = vadd.f32 %v924_v3, %v3195_v23  ;;  %v3211_v52 = vadd.f32 %v638_v36, %v2849_v42  ;;  %v727_v41 = vpop.f32.mrf.mxu1  ;;  %v1305_v21 = vmul.f32 %v1241_v59, %v3169_v49 }
 0x1ab   : > { %v989_v40 = vadd.f32 %v925_v57, %v3201_v48  ;;  %v3215_v55 = vadd.f32 %v727_v41, %v2851_v43 }
 0x1ac   : > { %v2377_v12 = vpop.eup %2376  ;;  %v798_v61 = vmul.f32 %v3211_v52, %v3211_v52  ;;  %v1052_v37 = vmul.f32 0.7978846, %v988_v18  ;;  %v1304_v18 = vmul.f32 %v1240_v47, %v3163_v28 }
 0x1ad   : > { %v2379_v50 = vpop.eup %2378  ;;  %v799_v29 = vmul.f32 %v3215_v55, %v3215_v55  ;;  %v1178_v44 = vadd.f32 1.0, %v2377_v12  ;;  %v1053_v45 = vmul.f32 0.7978846, %v989_v40 }
 0x1ae   : > { %v862_v35 = vmul.f32 %v798_v61, %v3211_v52  ;;  %v1179_v60 = vadd.f32 1.0, %v2379_v50  ;;  %2380 = vtanh.f32 %v1052_v37 }
 0x1af   : > { %v863_v22 = vmul.f32 %v799_v29, %v3215_v55  ;;  %v1242_v46 = vmul.f32 0.5, %v1178_v44  ;;  %2382 = vtanh.f32 %v1053_v45 }
 0x1b0   : > { %v926_v15 = vmul.f32 0.044715, %v862_v35  ;;  %v1243_v3 = vmul.f32 0.5, %v1179_v60 }
 0x1b1   : > { %v927_v57 = vmul.f32 0.044715, %v863_v22  ;;  %v641_v36 = vpop.f32.mrf.mxu0  ;;  %v1306_v41 = vmul.f32 %v1242_v46, %v3179_v54 }
 0x1b2   : > { %v990_v30 = vadd.f32 %v926_v15, %v3211_v52  ;;  %v3227_v40 = vadd.f32 %v641_v36, %v2849_v42  ;;  %v730_v12 = vpop.f32.mrf.mxu1  ;;  %v1307_v61 = vmul.f32 %v1243_v3, %v3183_v24  ;;  %v1336_v3 = vld [vmem:[#allocation2 + $0xb0] sm:$0xff] }
 0x1b3   : > { %v991_v37 = vadd.f32 %v927_v57, %v3215_v55  ;;  %v3233_v50 = vadd.f32 %v730_v12, %v2851_v43  ;;  %v1384_v29 = vpack.c.bf16 %v1306_v41, %v1304_v18 }
 0x1b4   : > { %v800_v28 = vmul.f32 %v3227_v40, %v3227_v40  ;;  %v1385_v54 = vpack.c.bf16 %v1307_v61, %v1305_v21  ;;  %v1054_v44 = vmul.f32 0.7978846, %v990_v30  ;;  %v2381_v47 = vpop.eup %2380 }
 0x1b5   : > { %v801_v45 = vmul.f32 %v3233_v50, %v3233_v50  ;;  %1576 = vmatmul.bf16.gmra.mxu2 %v1384_v29  ;;  %v1055_v35 = vmul.f32 0.7978846, %v991_v37  ;;  %v2383_v49 = vpop.eup %2382  ;;  %v1180_v46 = vadd.f32 1.0, %v2381_v47 }
 0x1b6   : > { %v864_v24 = vmul.f32 %v800_v28, %v3227_v40  ;;  %1665 = vmatmul.bf16.gmra.mxu3 %v1385_v54  ;;  %2384 = vtanh.f32 %v1054_v44  ;;  %v1181_v18 = vadd.f32 1.0, %v2383_v49 }
 0x1b7   : > { %v865_v60 = vmul.f32 %v801_v45, %v3233_v50  ;;  %2386 = vtanh.f32 %v1055_v35  ;;  %v1244_v44 = vmul.f32 0.5, %v1180_v46 }
 0x1b8   : > { %v928_v59 = vmul.f32 0.044715, %v864_v24  ;;  %v1537_v22 = vpop.f32.mrf.mxu2  ;;  %v1245_v24 = vmul.f32 0.5, %v1181_v18 }
 0x1b9   : > { %v929_v15 = vmul.f32 0.044715, %v865_v60  ;;  %v1626_v57 = vpop.f32.mrf.mxu3  ;;  %v643_v36 = vpop.f32.mrf.mxu0 }
 0x1ba   : > { %v992_v41 = vadd.f32 %v928_v59, %v3227_v40  ;;  %v1627_v30 = vadd.f32 %v1626_v57, %v1537_v22  ;;  %v3243_v12 = vadd.f32 %v643_v36, %v2849_v42  ;;  %v732_v21 = vpop.f32.mrf.mxu1 }
 0x1bb   : > { %v993_v61 = vadd.f32 %v929_v15, %v3233_v50  ;;  %v3247_v37 = vadd.f32 %v732_v21, %v2851_v43 }
 0x1bc   : > { %v2385_v29 = vpop.eup %2384  ;;  %v1706_v28 = vadd.f32 %v1627_v30, %v1336_v3  ;;  %v802_v54 = vmul.f32 %v3243_v12, %v3243_v12  ;;  %v1056_v47 = vmul.f32 0.7978846, %v992_v41  ;;  %v1337_v41 = vld [vmem:[#allocation2] sm:$0xff] }
 0x1bd   : > { %v2387_v45 = vpop.eup %2386  ;;  %v803_v35 = vmul.f32 %v3247_v37, %v3247_v37  ;;  %v1182_v49 = vadd.f32 1.0, %v2385_v29  ;;  %v1057_v60 = vmul.f32 0.7978846, %v993_v61  ;;  %v1308_v29 = vmul.f32 %v1244_v44, %v3195_v23 }
 0x1be   : > { %1738 = vst [vmem:[#allocation2 + $0xb0] sm:$0xff] %v1706_v28  ;;  %v866_v59 = vmul.f32 %v802_v54, %v3243_v12  ;;  %v1183_v22 = vadd.f32 1.0, %v2387_v45  ;;  %2388 = vtanh.f32 %v1056_v47  ;;  %v1309_v61 = vmul.f32 %v1245_v24, %v3201_v48 }
 0x1bf   : > { %v867_v15 = vmul.f32 %v803_v35, %v3247_v37  ;;  %v1246_v57 = vmul.f32 0.5, %v1182_v49  ;;  %2390 = vtanh.f32 %v1057_v60 }
 0x1c0   : > { %v930_v3 = vmul.f32 0.044715, %v866_v59  ;;  %v1539_v36 = vpop.f32.mrf.mxu2  ;;  %v1247_v30 = vmul.f32 0.5, %v1183_v22 }
 0x1c1   : > { %v931_v46 = vmul.f32 0.044715, %v867_v15  ;;  %v1628_v21 = vpop.f32.mrf.mxu3  ;;  %v646_v58 = vpop.f32.mrf.mxu0  ;;  %v1310_v18 = vmul.f32 %v1246_v57, %v3211_v52 }
 0x1c2   : > { %v994_v28 = vadd.f32 %v930_v3, %v3243_v12  ;;  %v1629_v54 = vadd.f32 %v1628_v21, %v1539_v36  ;;  %v3260_v45 = vadd.f32 %v646_v58, %v2849_v42  ;;  %v735_v47 = vpop.f32.mrf.mxu1  ;;  %v1311_v35 = vmul.f32 %v1247_v30, %v3215_v55 }
 0x1c3   : > { %v995_v49 = vadd.f32 %v931_v46, %v3247_v37  ;;  %v3265_v60 = vadd.f32 %v735_v47, %v2851_v43  ;;  %v1386_v59 = vpack.c.bf16 %v1310_v18, %v1308_v29 }
 0x1c4   : > { %v1707_v23 = vadd.f32 %v1629_v54, %v1337_v41  ;;  %v804_v52 = vmul.f32 %v3260_v45, %v3260_v45  ;;  %v1387_v48 = vpack.c.bf16 %v1311_v35, %v1309_v61  ;;  %v1058_v44 = vmul.f32 0.7978846, %v994_v28  ;;  %v2389_v24 = vpop.eup %2388  ;;  %v1338_v41 = vld [vmem:[#allocation2 + $0xd8] sm:$0xff] }
 0x1c5   : > { %v805_v58 = vmul.f32 %v3265_v60, %v3265_v60  ;;  %1581 = vmatmul.bf16.gmra.mxu2 %v1386_v59  ;;  %v1059_v22 = vmul.f32 0.7978846, %v995_v49  ;;  %v2391_v15 = vpop.eup %2390  ;;  %v1184_v30 = vadd.f32 1.0, %v2389_v24 }
 0x1c6   : > { %1739 = vst [vmem:[#allocation2] sm:$0xff] %v1707_v23  ;;  %v868_v55 = vmul.f32 %v804_v52, %v3260_v45  ;;  %1670 = vmatmul.bf16.gmra.mxu3 %v1387_v48  ;;  %2392 = vtanh.f32 %v1058_v44  ;;  %v1185_v18 = vadd.f32 1.0, %v2391_v15 }
 0x1c7   : > { %v869_v57 = vmul.f32 %v805_v58, %v3265_v60  ;;  %2394 = vtanh.f32 %v1059_v22  ;;  %v1248_v48 = vmul.f32 0.5, %v1184_v30 }
 0x1c8   : > { %v932_v3 = vmul.f32 0.044715, %v868_v55  ;;  %v1542_v36 = vpop.f32.mrf.mxu2  ;;  %v1249_v15 = vmul.f32 0.5, %v1185_v18 }
 0x1c9   : > { %v933_v46 = vmul.f32 0.044715, %v869_v57  ;;  %v1631_v21 = vpop.f32.mrf.mxu3  ;;  %v648_v29 = vpop.f32.mrf.mxu0 }
 0x1ca   : > { %v996_v61 = vadd.f32 %v932_v3, %v3260_v45  ;;  %v1632_v28 = vadd.f32 %v1631_v21, %v1542_v36  ;;  %v3275_v54 = vadd.f32 %v648_v29, %v2849_v42  ;;  %v737_v47 = vpop.f32.mrf.mxu1 }
 0x1cb   : > { %v997_v35 = vadd.f32 %v933_v46, %v3265_v60  ;;  %v3279_v49 = vadd.f32 %v737_v47, %v2851_v43 }
 0x1cc   : > { %v2393_v59 = vpop.eup %2392  ;;  %v1708_v23 = vadd.f32 %v1632_v28, %v1338_v41  ;;  %v806_v52 = vmul.f32 %v3275_v54, %v3275_v54  ;;  %v1060_v44 = vmul.f32 0.7978846, %v996_v61  ;;  %v1339_v61 = vld [vmem:[#allocation2 + $0x18] sm:$0xff] }
 0x1cd   : > { %v2395_v24 = vpop.eup %2394  ;;  %v807_v58 = vmul.f32 %v3279_v49, %v3279_v49  ;;  %v1186_v22 = vadd.f32 1.0, %v2393_v59  ;;  %v1061_v55 = vmul.f32 0.7978846, %v997_v35  ;;  %v1312_v59 = vmul.f32 %v1248_v48, %v3227_v40 }
 0x1ce   : > { %1740 = vst [vmem:[#allocation2 + $0xd8] sm:$0xff] %v1708_v23  ;;  %v870_v57 = vmul.f32 %v806_v52, %v3275_v54  ;;  %v1187_v3 = vadd.f32 1.0, %v2395_v24  ;;  %2396 = vtanh.f32 %v1060_v44  ;;  %v1313_v35 = vmul.f32 %v1249_v15, %v3233_v50 }
 0x1cf   : > { %v871_v36 = vmul.f32 %v807_v58, %v3279_v49  ;;  %v1250_v46 = vmul.f32 0.5, %v1186_v22  ;;  %2398 = vtanh.f32 %v1061_v55 }
 0x1d0   : > { %v934_v41 = vmul.f32 0.044715, %v870_v57  ;;  %v1544_v21 = vpop.f32.mrf.mxu2  ;;  %v1251_v29 = vmul.f32 0.5, %v1187_v3 }
 0x1d1   : > { %v935_v30 = vmul.f32 0.044715, %v871_v36  ;;  %v1633_v28 = vpop.f32.mrf.mxu3  ;;  %v651_v47 = vpop.f32.mrf.mxu0  ;;  %v1314_v18 = vmul.f32 %v1250_v46, %v3243_v12 }
 0x1d2   : > { %v998_v23 = vadd.f32 %v934_v41, %v3275_v54  ;;  %v1634_v52 = vadd.f32 %v1633_v28, %v1544_v21  ;;  %v3292_v24 = vadd.f32 %v651_v47, %v2849_v42  ;;  %v740_v44 = vpop.f32.mrf.mxu1  ;;  %v1315_v58 = vmul.f32 %v1251_v29, %v3247_v37  ;;  %v1340_v28 = vld [vmem:[#allocation2 + $0x50] sm:$0xff] }
 0x1d3   : > { %v999_v22 = vadd.f32 %v935_v30, %v3279_v49  ;;  %v3297_v55 = vadd.f32 %v740_v44, %v2851_v43  ;;  %v1388_v57 = vpack.c.bf16 %v1314_v18, %v1312_v59 }
 0x1d4   : > { %v1709_v40 = vadd.f32 %v1634_v52, %v1339_v61  ;;  %v808_v12 = vmul.f32 %v3292_v24, %v3292_v24  ;;  %v1389_v50 = vpack.c.bf16 %v1315_v58, %v1313_v35  ;;  %v1062_v48 = vmul.f32 0.7978846, %v998_v23  ;;  %v2397_v15 = vpop.eup %2396 }
 0x1d5   : > { %v809_v3 = vmul.f32 %v3297_v55, %v3297_v55  ;;  %1586 = vmatmul.bf16.gmra.mxu2 %v1388_v57  ;;  %v1063_v36 = vmul.f32 0.7978846, %v999_v22  ;;  %v2399_v46 = vpop.eup %2398  ;;  %v1188_v30 = vadd.f32 1.0, %v2397_v15 }
 0x1d6   : > { %1741 = vst [vmem:[#allocation2 + $0x18] sm:$0xff] %v1709_v40  ;;  %v872_v37 = vmul.f32 %v808_v12, %v3292_v24  ;;  %1675 = vmatmul.bf16.gmra.mxu3 %v1389_v50  ;;  %2400 = vtanh.f32 %v1062_v48  ;;  %v1189_v18 = vadd.f32 1.0, %v2399_v46 }
 0x1d7   : > { %v873_v41 = vmul.f32 %v809_v3, %v3297_v55  ;;  %2402 = vtanh.f32 %v1063_v36  ;;  %v1252_v48 = vmul.f32 0.5, %v1188_v30 }
 0x1d8   : > { %v936_v21 = vmul.f32 0.044715, %v872_v37  ;;  %v1547_v29 = vpop.f32.mrf.mxu2  ;;  %v1253_v37 = vmul.f32 0.5, %v1189_v18 }
 0x1d9   : > { %v937_v61 = vmul.f32 0.044715, %v873_v41  ;;  %v1636_v47 = vpop.f32.mrf.mxu3  ;;  %v653_v59 = vpop.f32.mrf.mxu0 }
 0x1da   : > { %v1000_v35 = vadd.f32 %v936_v21, %v3292_v24  ;;  %v1637_v23 = vadd.f32 %v1636_v47, %v1547_v29  ;;  %v3307_v52 = vadd.f32 %v653_v59, %v2849_v42  ;;  %v742_v44 = vpop.f32.mrf.mxu1 }
 0x1db   : > { %v1001_v58 = vadd.f32 %v937_v61, %v3297_v55  ;;  %v3311_v22 = vadd.f32 %v742_v44, %v2851_v43 }
 0x1dc   : > { %v2401_v57 = vpop.eup %2400  ;;  %v1064_v40 = vmul.f32 0.7978846, %v1000_v35  ;;  %v1710_v12 = vadd.f32 %v1637_v23, %v1340_v28  ;;  %v810_v50 = vmul.f32 %v3307_v52, %v3307_v52  ;;  %v1341_v35 = vld [vmem:[#allocation2 + $0x68] sm:$0xff] }
 0x1dd   : > { %v2403_v15 = vpop.eup %2402  ;;  %v1065_v3 = vmul.f32 0.7978846, %v1001_v58  ;;  %v811_v36 = vmul.f32 %v3311_v22, %v3311_v22  ;;  %v1190_v46 = vadd.f32 1.0, %v2401_v57  ;;  %v1316_v58 = vmul.f32 %v1252_v48, %v3260_v45 }
 0x1de   : > { %1742 = vst [vmem:[#allocation2 + $0x50] sm:$0xff] %v1710_v12  ;;  %v874_v41 = vmul.f32 %v810_v50, %v3307_v52  ;;  %v1191_v21 = vadd.f32 1.0, %v2403_v15  ;;  %2404 = vtanh.f32 %v1064_v40  ;;  %v1317_v57 = vmul.f32 %v1253_v37, %v3265_v60 }
 0x1df   : > { %v875_v29 = vmul.f32 %v811_v36, %v3311_v22  ;;  %v1254_v61 = vmul.f32 0.5, %v1190_v46  ;;  %2406 = vtanh.f32 %v1065_v3 }
 0x1e0   : > { %v938_v28 = vmul.f32 0.044715, %v874_v41  ;;  %v1549_v47 = vpop.f32.mrf.mxu2  ;;  %v1255_v59 = vmul.f32 0.5, %v1191_v21 }
 0x1e1   : > { %v939_v30 = vmul.f32 0.044715, %v875_v29  ;;  %v1638_v23 = vpop.f32.mrf.mxu3  ;;  %v656_v44 = vpop.f32.mrf.mxu0  ;;  %v1318_v18 = vmul.f32 %v1254_v61, %v3275_v54 }
 0x1e2   : > { %v1002_v12 = vadd.f32 %v938_v28, %v3307_v52  ;;  %v1639_v40 = vadd.f32 %v1638_v23, %v1549_v47  ;;  %v3324_v50 = vadd.f32 %v656_v44, %v2849_v42  ;;  %v745_v15 = vpop.f32.mrf.mxu1  ;;  %v1319_v3 = vmul.f32 %v1255_v59, %v3279_v49  ;;  %v1342_v23 = vld [vmem:[#allocation2 + $0x30] sm:$0xff] }
 0x1e3   : > { %v1003_v36 = vadd.f32 %v939_v30, %v3311_v22  ;;  %v3329_v46 = vadd.f32 %v745_v15, %v2851_v43  ;;  %v1390_v41 = vpack.c.bf16 %v1318_v18, %v1316_v58 }
 0x1e4   : > { %v1066_v45 = vmul.f32 0.7978846, %v1002_v12  ;;  %v1711_v48 = vadd.f32 %v1639_v40, %v1341_v35  ;;  %v812_v60 = vmul.f32 %v3324_v50, %v3324_v50  ;;  %v1391_v54 = vpack.c.bf16 %v1319_v3, %v1317_v57  ;;  %v2405_v37 = vpop.eup %2404 }
 0x1e5   : > { %v1067_v21 = vmul.f32 0.7978846, %v1003_v36  ;;  %v813_v29 = vmul.f32 %v3329_v46, %v3329_v46  ;;  %1591 = vmatmul.bf16.gmra.mxu2 %v1390_v41  ;;  %v2407_v61 = vpop.eup %2406  ;;  %v1192_v30 = vadd.f32 1.0, %v2405_v37 }
 0x1e6   : > { %2408 = vtanh.f32 %v1066_v45  ;;  %1743 = vst [vmem:[#allocation2 + $0x68] sm:$0xff] %v1711_v48  ;;  %v876_v49 = vmul.f32 %v812_v60, %v3324_v50  ;;  %1680 = vmatmul.bf16.gmra.mxu3 %v1391_v54  ;;  %v1193_v18 = vadd.f32 1.0, %v2407_v61 }
 0x1e7   : > { %2410 = vtanh.f32 %v1067_v21  ;;  %v877_v28 = vmul.f32 %v813_v29, %v3329_v46  ;;  %v1256_v54 = vmul.f32 0.5, %v1192_v30 }
 0x1e8   : > { %v940_v47 = vmul.f32 0.044715, %v876_v49  ;;  %v1552_v59 = vpop.f32.mrf.mxu2  ;;  %v1257_v49 = vmul.f32 0.5, %v1193_v18 }
 0x1e9   : > { %v941_v35 = vmul.f32 0.044715, %v877_v28  ;;  %v1641_v44 = vpop.f32.mrf.mxu3  ;;  %v658_v58 = vpop.f32.mrf.mxu0 }
 0x1ea   : > { %v1004_v57 = vadd.f32 %v940_v47, %v3324_v50  ;;  %v1642_v12 = vadd.f32 %v1641_v44, %v1552_v59  ;;  %v3339_v40 = vadd.f32 %v658_v58, %v2849_v42  ;;  %v747_v15 = vpop.f32.mrf.mxu1 }
 0x1eb   : > { %v1005_v3 = vadd.f32 %v941_v35, %v3329_v46  ;;  %v3343_v36 = vadd.f32 %v747_v15, %v2851_v43 }
 0x1ec   : > { %v2409_v41 = vpop.eup %2408  ;;  %v1068_v45 = vmul.f32 0.7978846, %v1004_v57  ;;  %v1712_v48 = vadd.f32 %v1642_v12, %v1342_v23  ;;  %v814_v60 = vmul.f32 %v3339_v40, %v3339_v40  ;;  %v1343_v57 = vld [vmem:[#allocation2 + $0x48] sm:$0xff] }
 0x1ed   : > { %v2411_v37 = vpop.eup %2410  ;;  %v1069_v21 = vmul.f32 0.7978846, %v1005_v3  ;;  %v815_v29 = vmul.f32 %v3343_v36, %v3343_v36  ;;  %v1194_v61 = vadd.f32 1.0, %v2409_v41  ;;  %v1320_v3 = vmul.f32 %v1256_v54, %v3292_v24 }
 0x1ee   : > { %1744 = vst [vmem:[#allocation2 + $0x30] sm:$0xff] %v1712_v48  ;;  %v878_v28 = vmul.f32 %v814_v60, %v3339_v40  ;;  %v1195_v47 = vadd.f32 1.0, %v2411_v37  ;;  %2412 = vtanh.f32 %v1068_v45  ;;  %v1321_v41 = vmul.f32 %v1257_v49, %v3297_v55 }
 0x1ef   : > { %v879_v59 = vmul.f32 %v815_v29, %v3343_v36  ;;  %v1258_v35 = vmul.f32 0.5, %v1194_v61  ;;  %2414 = vtanh.f32 %v1069_v21 }
 0x1f0   : > { %v942_v23 = vmul.f32 0.044715, %v878_v28  ;;  %v1554_v44 = vpop.f32.mrf.mxu2  ;;  %v1259_v58 = vmul.f32 0.5, %v1195_v47 }
 0x1f1   : > { %v943_v30 = vmul.f32 0.044715, %v879_v59  ;;  %v1643_v12 = vpop.f32.mrf.mxu3  ;;  %v661_v15 = vpop.f32.mrf.mxu0  ;;  %v1322_v18 = vmul.f32 %v1258_v35, %v3307_v52 }
 0x1f2   : > { %v1006_v48 = vadd.f32 %v942_v23, %v3339_v40  ;;  %v1644_v45 = vadd.f32 %v1643_v12, %v1554_v44  ;;  %v3356_v60 = vadd.f32 %v661_v15, %v2849_v42  ;;  %v750_v37 = vpop.f32.mrf.mxu1  ;;  %v1323_v21 = vmul.f32 %v1259_v58, %v3311_v22  ;;  %v1344_v12 = vld [vmem:[#allocation2 + $0x80] sm:$0xff] }
 0x1f3   : > { %v1007_v29 = vadd.f32 %v943_v30, %v3343_v36  ;;  %v3361_v61 = vadd.f32 %v750_v37, %v2851_v43  ;;  %v1392_v28 = vpack.c.bf16 %v1322_v18, %v1320_v3 }
 0x1f4   : > { %v1070_v24 = vmul.f32 0.7978846, %v1006_v48  ;;  %v1713_v54 = vadd.f32 %v1644_v45, %v1343_v57  ;;  %v816_v55 = vmul.f32 %v3356_v60, %v3356_v60  ;;  %v1393_v52 = vpack.c.bf16 %v1323_v21, %v1321_v41  ;;  %v2413_v49 = vpop.eup %2412 }
 0x1f5   : > { %v1071_v47 = vmul.f32 0.7978846, %v1007_v29  ;;  %v817_v59 = vmul.f32 %v3361_v61, %v3361_v61  ;;  %1596 = vmatmul.bf16.gmra.mxu2 %v1392_v28  ;;  %v2415_v35 = vpop.eup %2414  ;;  %v1196_v30 = vadd.f32 1.0, %v2413_v49 }
 0x1f6   : > { %2416 = vtanh.f32 %v1070_v24  ;;  %1745 = vst [vmem:[#allocation2 + $0x48] sm:$0xff] %v1713_v54  ;;  %v880_v22 = vmul.f32 %v816_v55, %v3356_v60  ;;  %1685 = vmatmul.bf16.gmra.mxu3 %v1393_v52  ;;  %v1197_v18 = vadd.f32 1.0, %v2415_v35 }
 0x1f7   : > { %2418 = vtanh.f32 %v1071_v47  ;;  %v881_v23 = vmul.f32 %v817_v59, %v3361_v61  ;;  %v1260_v52 = vmul.f32 0.5, %v1196_v30 }
 0x1f8   : > { %v944_v44 = vmul.f32 0.044715, %v880_v22  ;;  %v1557_v58 = vpop.f32.mrf.mxu2  ;;  %v1261_v22 = vmul.f32 0.5, %v1197_v18 }
 0x1f9   : > { %v945_v57 = vmul.f32 0.044715, %v881_v23  ;;  %v1646_v15 = vpop.f32.mrf.mxu3  ;;  %v663_v3 = vpop.f32.mrf.mxu0 }
 0x1fa   : > { %v1008_v41 = vadd.f32 %v944_v44, %v3356_v60  ;;  %v1647_v48 = vadd.f32 %v1646_v15, %v1557_v58  ;;  %v3371_v45 = vadd.f32 %v663_v3, %v2849_v42  ;;  %v752_v37 = vpop.f32.mrf.mxu1  ;;  %v1324_v3 = vmul.f32 %v1260_v52, %v3324_v50 }
 0x1fb   : > { %v1009_v21 = vadd.f32 %v945_v57, %v3361_v61  ;;  %v3375_v29 = vadd.f32 %v752_v37, %v2851_v43 }
 0x1fc   : > { %v2417_v28 = vpop.eup %2416  ;;  %v1072_v24 = vmul.f32 0.7978846, %v1008_v41  ;;  %v1714_v54 = vadd.f32 %v1647_v48, %v1344_v12  ;;  %v818_v55 = vmul.f32 %v3371_v45, %v3371_v45  ;;  %v1345_v48 = vld [vmem:[#allocation2 + $0x88] sm:$0xff] }
 0x1fd   : > { %v2419_v49 = vpop.eup %2418  ;;  %v1073_v47 = vmul.f32 0.7978846, %v1009_v21  ;;  %v819_v59 = vmul.f32 %v3375_v29, %v3375_v29  ;;  %v1198_v35 = vadd.f32 1.0, %v2417_v28  ;;  %v1325_v28 = vmul.f32 %v1261_v22, %v3329_v46 }
 0x1fe   : > { %1746 = vst [vmem:[#allocation2 + $0x80] sm:$0xff] %v1714_v54  ;;  %v882_v23 = vmul.f32 %v818_v55, %v3371_v45  ;;  %v1199_v44 = vadd.f32 1.0, %v2419_v49  ;;  %2420 = vtanh.f32 %v1072_v24 }
 0x1ff   : > { %v883_v58 = vmul.f32 %v819_v59, %v3375_v29  ;;  %v1262_v57 = vmul.f32 0.5, %v1198_v35  ;;  %2422 = vtanh.f32 %v1073_v47 }
 0x200   : > { %v946_v12 = vmul.f32 0.044715, %v882_v23  ;;  %v1559_v15 = vpop.f32.mrf.mxu2  ;;  %v1263_v30 = vmul.f32 0.5, %v1199_v44 }
 0x201   : > { %v947_v41 = vmul.f32 0.044715, %v883_v58  ;;  %v1648_v37 = vpop.f32.mrf.mxu3  ;;  %v666_v21 = vpop.f32.mrf.mxu0  ;;  %v1326_v18 = vmul.f32 %v1262_v57, %v3339_v40 }
 0x202   : > { %v1010_v54 = vadd.f32 %v946_v12, %v3371_v45  ;;  %v1649_v55 = vadd.f32 %v1648_v37, %v1559_v15  ;;  %v3388_v49 = vadd.f32 %v666_v21, %v2849_v42  ;;  %v755_v24 = vpop.f32.mrf.mxu1  ;;  %v1327_v59 = vmul.f32 %v1263_v30, %v3343_v36 }
 0x203   : > { %v1011_v50 = vadd.f32 %v947_v41, %v3375_v29  ;;  %v3393_v52 = vadd.f32 %v755_v24, %v2851_v43  ;;  %v1394_v47 = vpack.c.bf16 %v1326_v18, %v1324_v3  ;;  %v1346_v41 = vld [vmem:[#allocation2 + $0xe8] sm:$0xff] }
 0x204   : > { %v1074_v35 = vmul.f32 0.7978846, %v1010_v54  ;;  %v1715_v23 = vadd.f32 %v1649_v55, %v1345_v48  ;;  %v820_v46 = vmul.f32 %v3388_v49, %v3388_v49  ;;  %v1395_v40 = vpack.c.bf16 %v1327_v59, %v1325_v28  ;;  %v2421_v58 = vpop.eup %2420 }
 0x205   : > { %v1075_v22 = vmul.f32 0.7978846, %v1011_v50  ;;  %v821_v44 = vmul.f32 %v3393_v52, %v3393_v52  ;;  %1601 = vmatmul.bf16.gmra.mxu2 %v1394_v47  ;;  %v2423_v57 = vpop.eup %2422  ;;  %v1200_v21 = vadd.f32 1.0, %v2421_v58 }
 0x206   : > { %2424 = vtanh.f32 %v1074_v35  ;;  %1747 = vst [vmem:[#allocation2 + $0x88] sm:$0xff] %v1715_v23  ;;  %v884_v36 = vmul.f32 %v820_v46, %v3388_v49  ;;  %1690 = vmatmul.bf16.gmra.mxu3 %v1395_v40  ;;  %v1201_v24 = vadd.f32 1.0, %v2423_v57 }
 0x207   : > { %2426 = vtanh.f32 %v1075_v22  ;;  %v885_v12 = vmul.f32 %v821_v44, %v3393_v52  ;;  %v1264_v58 = vmul.f32 0.5, %v1200_v21 }
 0x208   : > { %v948_v15 = vmul.f32 0.044715, %v884_v36  ;;  %v1562_v3 = vpop.f32.mrf.mxu2 }
 0x209   : > { %v949_v30 = vmul.f32 0.044715, %v885_v12  ;;  %v1651_v48 = vpop.f32.mrf.mxu3  ;;  %v668_v37 = vpop.f32.mrf.mxu0  ;;  %v1265_v12 = vmul.f32 0.5, %v1201_v24 }
 0x20a   : > { %v1012_v18 = vadd.f32 %v948_v15, %v3388_v49  ;;  %v1652_v28 = vadd.f32 %v1651_v48, %v1562_v3  ;;  %v3403_v54 = vadd.f32 %v668_v37, %v2849_v42  ;;  %v757_v55 = vpop.f32.mrf.mxu1  ;;  %v1347_v37 = vld [vmem:[#allocation2 + $0xb8] sm:$0xff] }
 0x20b   : > { %v1013_v59 = vadd.f32 %v949_v30, %v3393_v52  ;;  %v3407_v50 = vadd.f32 %v757_v55, %v2851_v43  ;;  %v1329_v24 = vmul.f32 %v1265_v12, %v3361_v61 }
 0x20c   : > { %v2425_v47 = vpop.eup %2424  ;;  %v1076_v35 = vmul.f32 0.7978846, %v1012_v18  ;;  %v1716_v23 = vadd.f32 %v1652_v28, %v1346_v41  ;;  %v822_v46 = vmul.f32 %v3403_v54, %v3403_v54  ;;  %v1328_v28 = vmul.f32 %v1264_v58, %v3356_v60  ;;  %v1348_v58 = vld [vmem:[#allocation2 + $0x60] sm:$0xff] }
 0x20d   : > { %v2427_v40 = vpop.eup %2426  ;;  %v1077_v22 = vmul.f32 0.7978846, %v1013_v59  ;;  %v823_v44 = vmul.f32 %v3407_v50, %v3407_v50  ;;  %v1202_v42 = vadd.f32 1.0, %v2425_v47 }
 0x20e   : > { %1748 = vst [vmem:[#allocation2 + $0xe8] sm:$0xff] %v1716_v23  ;;  %v886_v36 = vmul.f32 %v822_v46, %v3403_v54  ;;  %v1203_v57 = vadd.f32 1.0, %v2427_v40  ;;  %2428 = vtanh.f32 %v1076_v35 }
 0x20f   : > { %v887_v43 = vmul.f32 %v823_v44, %v3407_v50  ;;  %v1266_v15 = vmul.f32 0.5, %v1202_v42  ;;  %2430 = vtanh.f32 %v1077_v22 }
 0x210   : > { %v950_v3 = vmul.f32 0.044715, %v886_v36  ;;  %v1564_v30 = vpop.f32.mrf.mxu2  ;;  %v1267_v41 = vmul.f32 0.5, %v1203_v57 }
 0x211   : > { %v951_v48 = vmul.f32 0.044715, %v887_v43  ;;  %v1653_v18 = vpop.f32.mrf.mxu3  ;;  %v1330_v21 = vmul.f32 %v1266_v15, %v3371_v45 }
 0x212   : > { %v1014_v55 = vadd.f32 %v950_v3, %v3403_v54  ;;  %v1654_v59 = vadd.f32 %v1653_v18, %v1564_v30  ;;  %v1331_v47 = vmul.f32 %v1267_v41, %v3375_v29 }
 0x213   : > { %v1015_v35 = vadd.f32 %v951_v48, %v3407_v50  ;;  %v1396_v23 = vpack.c.bf16 %v1330_v21, %v1328_v28  ;;  %v1349_v21 = vld [vmem:[#allocation2 + $0xf0] sm:$0xff] }
 0x214   : > { %v1078_v46 = vmul.f32 0.7978846, %v1014_v55  ;;  %v1717_v40 = vadd.f32 %v1654_v59, %v1347_v37  ;;  %v1397_v22 = vpack.c.bf16 %v1331_v47, %v1329_v24  ;;  %v2429_v42 = vpop.eup %2428 }
 0x215   : > { %v1079_v44 = vmul.f32 0.7978846, %v1015_v35  ;;  %1606 = vmatmul.bf16.gmra.mxu2 %v1396_v23  ;;  %v2431_v60 = vpop.eup %2430  ;;  %v1204_v61 = vadd.f32 1.0, %v2429_v42  ;;  %v1350_v42 = vld [vmem:[#allocation2 + $0x8] sm:$0xff] }
 0x216   : > { %2432 = vtanh.f32 %v1078_v46  ;;  %1749 = vst [vmem:[#allocation2 + $0xb8] sm:$0xff] %v1717_v40  ;;  %1695 = vmatmul.bf16.gmra.mxu3 %v1397_v22  ;;  %v1205_v29 = vadd.f32 1.0, %v2431_v60 }
 0x217   : > { %2434 = vtanh.f32 %v1079_v44  ;;  %v1268_v30 = vmul.f32 0.5, %v1204_v61 }
 0x218   : > { %v1567_v45 = vpop.f32.mrf.mxu2  ;;  %v1269_v48 = vmul.f32 0.5, %v1205_v29 }
 0x219   : > { %v1656_v36 = vpop.f32.mrf.mxu3  ;;  %v1332_v59 = vmul.f32 %v1268_v30, %v3388_v49 }
 0x21a   : > { %v1657_v57 = vadd.f32 %v1656_v36, %v1567_v45  ;;  %v1333_v35 = vmul.f32 %v1269_v48, %v3393_v52  ;;  %v1351_v36 = vld [vmem:[#allocation2 + $0x78] sm:$0xff] }
 0x21c   : > { %v2433_v12 = vpop.eup %2432  ;;  %v1718_v43 = vadd.f32 %v1657_v57, %v1348_v58 }
 0x21d   : > { %v2435_v15 = vpop.eup %2434  ;;  %v1206_v3 = vadd.f32 1.0, %v2433_v12 }
 0x21e   : > { %1750 = vst [vmem:[#allocation2 + $0x60] sm:$0xff] %v1718_v43  ;;  %v1207_v41 = vadd.f32 1.0, %v2435_v15 }
 0x21f   : > { %v1270_v37 = vmul.f32 0.5, %v1206_v3  ;;  %v1353_v3 = vld [vmem:[#allocation2 + $0x58] sm:$0xff] }
 0x220   : > { %v1569_v18 = vpop.f32.mrf.mxu2  ;;  %v1271_v28 = vmul.f32 0.5, %v1207_v41 }
 0x221   : > { %v1658_v55 = vpop.f32.mrf.mxu3  ;;  %v1334_v24 = vmul.f32 %v1270_v37, %v3403_v54 }
 0x222   : > { %v1659_v47 = vadd.f32 %v1658_v55, %v1569_v18  ;;  %v1335_v23 = vmul.f32 %v1271_v28, %v3407_v50  ;;  %v1352_v50 = vld [vmem:[#allocation2 + $0x38] sm:$0xff]  ;;  %v1354_v18 = vld [vmem:[#allocation2 + $0x40] sm:$0xff] }
 0x223   : > { %v1398_v46 = vpack.c.bf16 %v1334_v24, %v1332_v59  ;;  %v1355_v24 = vld [vmem:[#allocation2 + $0xc8] sm:$0xff] }
 0x224   : > { %v1719_v40 = vadd.f32 %v1659_v47, %v1349_v21  ;;  %v1399_v22 = vpack.c.bf16 %v1335_v23, %v1333_v35 }
 0x225   : > { %1611 = vmatmul.bf16.gmra.mxu2 %v1398_v46 }
 0x226   : > { %1751 = vst [vmem:[#allocation2 + $0xf0] sm:$0xff] %v1719_v40  ;;  %1700 = vmatmul.bf16.gmra.mxu3 %v1399_v22  ;;  %v1356_v40 = vld [vmem:[#allocation2 + $0xe0] sm:$0xff] }
 0x228   : > { %v1572_v44 = vpop.f32.mrf.mxu2 }
 0x229   : > { %v1661_v60 = vpop.f32.mrf.mxu3 }
 0x22a   : > { %v1662_v45 = vadd.f32 %v1661_v60, %v1572_v44 }
 0x22c   : > { %v1720_v58 = vadd.f32 %v1662_v45, %v1350_v42  ;;  %v1357_v45 = vld [vmem:[#allocation2 + $0x90] sm:$0xff] }
 0x22e   : > { %1752 = vst [vmem:[#allocation2 + $0x8] sm:$0xff] %v1720_v58 }
 0x230   : > { %v1574_v49 = vpop.f32.mrf.mxu2 }
 0x231   : > { %v1663_v54 = vpop.f32.mrf.mxu3 }
 0x232   : > { %v1664_v61 = vadd.f32 %v1663_v54, %v1574_v49 }
 0x234   : > { %v1721_v57 = vadd.f32 %v1664_v61, %v1351_v36  ;;  %v1358_v61 = vld [vmem:[#allocation2 + $0x70] sm:$0xff] }
 0x236   : > { %1753 = vst [vmem:[#allocation2 + $0x78] sm:$0xff] %v1721_v57 }
 0x238   : > { %v1577_v52 = vpop.f32.mrf.mxu2 }
 0x239   : > { %v1666_v29 = vpop.f32.mrf.mxu3 }
 0x23a   : > { %v1667_v12 = vadd.f32 %v1666_v29, %v1577_v52 }
 0x23c   : > { %v1722_v43 = vadd.f32 %v1667_v12, %v1352_v50  ;;  %v1359_v12 = vld [vmem:[#allocation2 + $0xc0] sm:$0xff] }
 0x23e   : > { %1754 = vst [vmem:[#allocation2 + $0x38] sm:$0xff] %v1722_v43 }
 0x240   : > { %v1579_v15 = vpop.f32.mrf.mxu2 }
 0x241   : > { %v1668_v30 = vpop.f32.mrf.mxu3 }
 0x242   : > { %v1669_v41 = vadd.f32 %v1668_v30, %v1579_v15 }
 0x244   : > { %v1723_v48 = vadd.f32 %v1669_v41, %v1353_v3  ;;  %v1360_v41 = vld [vmem:[#allocation2 + $0xa8] sm:$0xff] }
 0x246   : > { %1755 = vst [vmem:[#allocation2 + $0x58] sm:$0xff] %v1723_v48 }
 0x248   : > { %v1582_v37 = vpop.f32.mrf.mxu2 }
 0x249   : > { %v1671_v28 = vpop.f32.mrf.mxu3 }
 0x24a   : > { %v1672_v21 = vadd.f32 %v1671_v28, %v1582_v37 }
 0x24c   : > { %v1724_v55 = vadd.f32 %v1672_v21, %v1354_v18  ;;  %v1361_v21 = vld [vmem:[#allocation2 + $0xd0] sm:$0xff] }
 0x24e   : > { %1756 = vst [vmem:[#allocation2 + $0x40] sm:$0xff] %v1724_v55 }
 0x250   : > { %v1584_v59 = vpop.f32.mrf.mxu2 }
 0x251   : > { %v1673_v47 = vpop.f32.mrf.mxu3 }
 0x252   : > { %v1674_v35 = vadd.f32 %v1673_v47, %v1584_v59 }
 0x254   : > { %v1725_v23 = vadd.f32 %v1674_v35, %v1355_v24  ;;  %v1362_v35 = vld [vmem:[#allocation2 + $0x10] sm:$0xff] }
 0x256   : > { %1757 = vst [vmem:[#allocation2 + $0xc8] sm:$0xff] %v1725_v23 }
 0x258   : > { %v1587_v46 = vpop.f32.mrf.mxu2 }
 0x259   : > { %v1676_v22 = vpop.f32.mrf.mxu3 }
 0x25a   : > { %v1677_v44 = vadd.f32 %v1676_v22, %v1587_v46 }
 0x25c   : > { %v1726_v42 = vadd.f32 %v1677_v44, %v1356_v40  ;;  %v1363_v44 = vld [vmem:[#allocation2 + $0x28] sm:$0xff] }
 0x25e   : > { %1758 = vst [vmem:[#allocation2 + $0xe0] sm:$0xff] %v1726_v42 }
 0x260   : > { %v1589_v60 = vpop.f32.mrf.mxu2 }
 0x261   : > { %v1678_v58 = vpop.f32.mrf.mxu3 }
 0x262   : > { %v1679_v49 = vadd.f32 %v1678_v58, %v1589_v60 }
 0x264   : > { %v1727_v36 = vadd.f32 %v1679_v49, %v1357_v45  ;;  %v1364_v49 = vld [vmem:[#allocation2 + $0xa0] sm:$0xff] }
 0x266   : > { %1759 = vst [vmem:[#allocation2 + $0x90] sm:$0xff] %v1727_v36 }
 0x268   : > { %v1592_v54 = vpop.f32.mrf.mxu2 }
 0x269   : > { %v1681_v57 = vpop.f32.mrf.mxu3 }
 0x26a   : > { %v1682_v52 = vadd.f32 %v1681_v57, %v1592_v54 }
 0x26c   : > { %v1728_v50 = vadd.f32 %v1682_v52, %v1358_v61  ;;  %v1365_v52 = vld [vmem:[#allocation2 + $0xf8] sm:$0xff] }
 0x26e   : > { %1760 = vst [vmem:[#allocation2 + $0x70] sm:$0xff] %v1728_v50 }
 0x270   : > { %v1594_v29 = vpop.f32.mrf.mxu2 }
 0x271   : > { %v1683_v43 = vpop.f32.mrf.mxu3 }
 0x272   : > { %v1684_v15 = vadd.f32 %v1683_v43, %v1594_v29 }
 0x274   : > { %v1729_v3 = vadd.f32 %v1684_v15, %v1359_v12  ;;  %v1366_v15 = vld [vmem:[#allocation2 + $0x20] sm:$0xff] }
 0x276   : > { %1761 = vst [vmem:[#allocation2 + $0xc0] sm:$0xff] %v1729_v3 }
 0x278   : > { %v1597_v30 = vpop.f32.mrf.mxu2 }
 0x279   : > { %v1686_v48 = vpop.f32.mrf.mxu3 }
 0x27a   : > { %v1687_v37 = vadd.f32 %v1686_v48, %v1597_v30 }
 0x27c   : > { %v1730_v18 = vadd.f32 %v1687_v37, %v1360_v41  ;;  %v1367_v37 = vld [vmem:[#allocation2 + $0x98] sm:$0xff] }
 0x27e   : > { %1762 = vst [vmem:[#allocation2 + $0xa8] sm:$0xff] %v1730_v18 }
 0x280   : > { %v1599_v28 = vpop.f32.mrf.mxu2 }
 0x281   : > { %v1688_v55 = vpop.f32.mrf.mxu3 }
 0x282   : > { %v1689_v59 = vadd.f32 %v1688_v55, %v1599_v28 }
 0x284   : > { %v1731_v24 = vadd.f32 %v1689_v59, %v1361_v21 }
 0x286   : > { %1763 = vst [vmem:[#allocation2 + $0xd0] sm:$0xff] %v1731_v24 }
 0x288   : > { %v1602_v47 = vpop.f32.mrf.mxu2 }
 0x289   : > { %v1691_v23 = vpop.f32.mrf.mxu3 }
 0x28a   : > { %v1692_v46 = vadd.f32 %v1691_v23, %v1602_v47 }
 0x28c   : > { %v1732_v40 = vadd.f32 %v1692_v46, %v1362_v35 }
 0x28e   : > { %1764 = vst [vmem:[#allocation2 + $0x10] sm:$0xff] %v1732_v40 }
 0x290   : > { %v1604_v22 = vpop.f32.mrf.mxu2 }
 0x291   : > { %v1693_v42 = vpop.f32.mrf.mxu3 }
 0x292   : > { %v1694_v60 = vadd.f32 %v1693_v42, %v1604_v22 }
 0x294   : > { %v1733_v45 = vadd.f32 %v1694_v60, %v1363_v44 }
 0x296   : > { %1765 = vst [vmem:[#allocation2 + $0x28] sm:$0xff] %v1733_v45 }
 0x298   : > { %v1607_v58 = vpop.f32.mrf.mxu2 }
 0x299   : > { %v1696_v36 = vpop.f32.mrf.mxu3 }
 0x29a   : > { %v1697_v54 = vadd.f32 %v1696_v36, %v1607_v58 }
 0x29c   : > { %v1734_v61 = vadd.f32 %v1697_v54, %v1364_v49 }
 0x29e   : > { %1766 = vst [vmem:[#allocation2 + $0xa0] sm:$0xff] %v1734_v61 }
 0x2a0   : > { %v1609_v57 = vpop.f32.mrf.mxu2 }
 0x2a1   : > { %v1698_v50 = vpop.f32.mrf.mxu3 }
 0x2a2   : > { %v1699_v29 = vadd.f32 %v1698_v50, %v1609_v57 }
 0x2a4   : > { %v1735_v12 = vadd.f32 %v1699_v29, %v1365_v52 }
 0x2a6   : > { %1767 = vst [vmem:[#allocation2 + $0xf8] sm:$0xff] %v1735_v12 }
 0x2a8   : > { %v1612_v43 = vpop.f32.mrf.mxu2 }
 0x2a9   : > { %v1701_v3 = vpop.f32.mrf.mxu3 }
 0x2aa   : > { %v1702_v30 = vadd.f32 %v1701_v3, %v1612_v43 }
 0x2ac   : > { %v1736_v41 = vadd.f32 %v1702_v30, %v1366_v15 }
 0x2ae   : > { %1768 = vst [vmem:[#allocation2 + $0x20] sm:$0xff] %v1736_v41 }
 0x2b0   : > { %v1614_v48 = vpop.f32.mrf.mxu2 }
 0x2b1   : > { %v1703_v18 = vpop.f32.mrf.mxu3 }
 0x2b2   : > { %v1704_v28 = vadd.f32 %v1703_v18, %v1614_v48  ;;  %1773 = sbr.rel (%p2178_p7) target bundleno = 732 (0x2dc), region = 86 }
 0x2b4   : > { %v1737_v21 = vadd.f32 %v1704_v28, %v1367_v37 }
 0x2b6   : > { %1769 = vst [vmem:[#allocation2 + $0x98] sm:$0xff] %v1737_v21 }
 0x2b7   : > { %v1774_v55 = vld [vmem:[#allocation2 + $0xb0] sm:$0xff]  ;;  %v3429_v59 = vld [vmem:[%s3582_s4] ss:$0 sm:$0xff]  ;;  %v1776_v47 = vld [vmem:[#allocation2 + $0xd8] sm:$0xff] }
 0x2b8   : > { %v1775_v24 = vld [vmem:[#allocation2] sm:$0xff]  ;;  %v1777_v35 = vld [vmem:[#allocation2 + $0x18] sm:$0xff]  ;;  %v1810_v23 = vadd.f32 %v3429_v59, %v1774_v55  ;;  %v1812_v40 = vadd.f32 %v3429_v59, %v1776_v47  ;;  %v1778_v44 = vld [vmem:[#allocation2 + $0x50] sm:$0xff] }
 0x2b9   : > { %v1811_v46 = vadd.f32 %v3429_v59, %v1775_v24  ;;  %v1813_v22 = vadd.f32 %v3429_v59, %v1777_v35  ;;  %v1779_v42 = vld [vmem:[#allocation2 + $0x68] sm:$0xff]  ;;  %v1780_v60 = vld [vmem:[#allocation2 + $0x30] sm:$0xff]  ;;  %v1814_v45 = vadd.f32 %v3429_v59, %v1778_v44  ;;  %v1782_v36 = vld [vmem:[#allocation2 + $0x80] sm:$0xff] }
 0x2ba   : > { %v1815_v58 = vadd.f32 %v3429_v59, %v1779_v42  ;;  %v1781_v49 = vld [vmem:[#allocation2 + $0x48] sm:$0xff]  ;;  %v1842_v54 = vadd.f32 %v1810_v23, %v2761_v0  ;;  %v1844_v57 = vadd.f32 %v1812_v40, %v2769_v4  ;;  %v1816_v52 = vadd.f32 %v3429_v59, %v1780_v60  ;;  %v1785_v3 = vld [vmem:[#allocation2 + $0xb8] sm:$0xff]  ;;  %v1786_v30 = vld [vmem:[#allocation2 + $0x60] sm:$0xff] }
 0x2bb   : > { %v1843_v61 = vadd.f32 %v1811_v46, %v2764_v1  ;;  %v1783_v50 = vld [vmem:[#allocation2 + $0x88] sm:$0xff]  ;;  %v1845_v29 = vadd.f32 %v1813_v22, %v2772_v5  ;;  %v1817_v12 = vadd.f32 %v3429_v59, %v1781_v49  ;;  %v1846_v15 = vadd.f32 %v1814_v45, %v2777_v7  ;;  %v1787_v48 = vld [vmem:[#allocation2 + $0xf0] sm:$0xff]  ;;  %v1789_v21 = vld [vmem:[#allocation2 + $0x78] sm:$0xff] }
 0x2bc   : > { %v1784_v43 = vld [vmem:[#allocation2 + $0xe8] sm:$0xff]  ;;  %1874 = vst [vmem:[%s2725_s28] sm:$0xff] %v1842_v54  ;;  %v1818_v0 = vadd.f32 %v3429_v59, %v1782_v36  ;;  %v1847_v1 = vadd.f32 %v1815_v58, %v2780_v8  ;;  %v1819_v4 = vadd.f32 %v3429_v59, %v1783_v50  ;;  %v1848_v5 = vadd.f32 %v1816_v52, %v2785_v10  ;;  %v1790_v24 = vld [vmem:[#allocation2 + $0x38] sm:$0xff]  ;;  %v1792_v46 = vld [vmem:[#allocation2 + $0x40] sm:$0xff] }
 0x2bd   : > { %1875 = vst [vmem:[%s2725_s28 + $0x8] sm:$0xff] %v1843_v61  ;;  %v1820_v41 = vadd.f32 %v3429_v59, %v1784_v43  ;;  %v1849_v7 = vadd.f32 %v1817_v12, %v2788_v11  ;;  %v1821_v37 = vadd.f32 %v3429_v59, %v1785_v3  ;;  %v1788_v18 = vld [vmem:[#allocation2 + $0x8] sm:$0xff]  ;;  %v1822_v28 = vadd.f32 %v3429_v59, %v1786_v30  ;;  %v1791_v35 = vld [vmem:[#allocation2 + $0x58] sm:$0xff]  ;;  %v1794_v42 = vld [vmem:[#allocation2 + $0xe0] sm:$0xff] }
 0x2be   : > { %1876 = vst [vmem:[%s2725_s28 + $0x10] sm:$0xff] %v1844_v57  ;;  %v1850_v8 = vadd.f32 %v1818_v0, %v2793_v13  ;;  %v1851_v10 = vadd.f32 %v1819_v4, %v2796_v14  ;;  %v1823_v55 = vadd.f32 %v3429_v59, %v1787_v48  ;;  %v1824_v47 = vadd.f32 %v3429_v59, %v1788_v18  ;;  %v1793_v22 = vld [vmem:[#allocation2 + $0xc8] sm:$0xff]  ;;  %v1795_v45 = vld [vmem:[#allocation2 + $0x90] sm:$0xff]  ;;  %v1797_v54 = vld [vmem:[#allocation2 + $0xc0] sm:$0xff] }
 0x2bf   : > { %1877 = vst [vmem:[%s2725_s28 + $0x18] sm:$0xff] %v1845_v29  ;;  %v1852_v11 = vadd.f32 %v1820_v41, %v2801_v16  ;;  %v1853_v13 = vadd.f32 %v1821_v37, %v2804_v17  ;;  %v1825_v23 = vadd.f32 %v3429_v59, %v1789_v21  ;;  %v1854_v14 = vadd.f32 %v1822_v28, %v2809_v19  ;;  %v1796_v49 = vld [vmem:[#allocation2 + $0x70] sm:$0xff]  ;;  %v1798_v57 = vld [vmem:[#allocation2 + $0xa8] sm:$0xff]  ;;  %v1802_v3 = vld [vmem:[#allocation2 + $0xa0] sm:$0xff] }
 0x2c0   : > { %1878 = vst [vmem:[%s2725_s28 + $0x20] sm:$0xff] %v1846_v15  ;;  %v1826_v40 = vadd.f32 %v3429_v59, %v1790_v24  ;;  %v1855_v16 = vadd.f32 %v1823_v55, %v2812_v20  ;;  %v1827_v44 = vadd.f32 %v3429_v59, %v1791_v35  ;;  %v1856_v17 = vadd.f32 %v1824_v47, %v2821_v26  ;;  %v1799_v50 = vld [vmem:[#allocation2 + $0xd0] sm:$0xff]  ;;  %v1801_v15 = vld [vmem:[#allocation2 + $0x28] sm:$0xff]  ;;  %v1803_v4 = vld [vmem:[#allocation2 + $0xf8] sm:$0xff] }
 0x2c1   : > { %1879 = vst [vmem:[%s2725_s28 + $0x28] sm:$0xff] %v1847_v1  ;;  %v1828_v60 = vadd.f32 %v3429_v59, %v1792_v46  ;;  %v1857_v19 = vadd.f32 %v1825_v23, %v2824_v27  ;;  %v1829_v58 = vadd.f32 %v3429_v59, %v1793_v22  ;;  %v1830_v36 = vadd.f32 %v3429_v59, %v1794_v42  ;;  %v1800_v12 = vld [vmem:[#allocation2 + $0x10] sm:$0xff]  ;;  %v1805_v48 = vld [vmem:[#allocation2 + $0x98] sm:$0xff]  ;;  %v3603_v21 = vld [vmem:[#allocation13_spill] sm:$0xff] }
 0x2c2   : > { %1880 = vst [vmem:[%s2725_s28 + $0x30] sm:$0xff] %v1848_v5  ;;  %v1858_v20 = vadd.f32 %v1826_v40, %v2842_v38  ;;  %v1859_v26 = vadd.f32 %v1827_v44, %v2845_v39  ;;  %v1831_v61 = vadd.f32 %v3429_v59, %v1795_v45  ;;  %v1832_v52 = vadd.f32 %v3429_v59, %v1796_v49  ;;  %v1804_v5 = vld [vmem:[#allocation2 + $0x20] sm:$0xff] }
 0x2c3   : > { %1881 = vst [vmem:[%s2725_s28 + $0x38] sm:$0xff] %v1849_v7  ;;  %v1860_v27 = vadd.f32 %v1828_v60, %v2882_v6  ;;  %v1861_v38 = vadd.f32 %v1829_v58, %v2885_v9  ;;  %v1833_v29 = vadd.f32 %v3429_v59, %v1797_v54  ;;  %v1862_v39 = vadd.f32 %v1830_v36, %v2918_v63 }
 0x2c4   : > { %1882 = vst [vmem:[%s2725_s28 + $0x40] sm:$0xff] %v1850_v8  ;;  %v1834_v43 = vadd.f32 %v3429_v59, %v1798_v57  ;;  %v1863_v6 = vadd.f32 %v1831_v61, %v2921_v2  ;;  %v1835_v0 = vadd.f32 %v3429_v59, %v1799_v50  ;;  %v1864_v9 = vadd.f32 %v1832_v52, %v2958_v32 }
 0x2c5   : > { %1883 = vst [vmem:[%s2725_s28 + $0x48] sm:$0xff] %v1851_v10  ;;  %v1836_v1 = vadd.f32 %v3429_v59, %v1800_v12  ;;  %v1865_v63 = vadd.f32 %v1833_v29, %v2961_v33  ;;  %v1837_v30 = vadd.f32 %v3429_v59, %v1801_v15  ;;  %v1838_v41 = vadd.f32 %v3429_v59, %v1802_v3 }
 0x2c6   : > { %1884 = vst [vmem:[%s2725_s28 + $0x50] sm:$0xff] %v1852_v11  ;;  %v1866_v2 = vadd.f32 %v1834_v43, %v2998_v62  ;;  %v1867_v32 = vadd.f32 %v1835_v0, %v3001_v53  ;;  %v1839_v7 = vadd.f32 %v3429_v59, %v1803_v4  ;;  %v1840_v37 = vadd.f32 %v3429_v59, %v1804_v5 }
 0x2c7   : > { %1885 = vst [vmem:[%s2725_s28 + $0x58] sm:$0xff] %v1853_v13  ;;  %v1868_v33 = vadd.f32 %v1836_v1, %v3038_v31  ;;  %v1869_v62 = vadd.f32 %v1837_v30, %v3041_v34  ;;  %v1841_v18 = vadd.f32 %v3429_v59, %v1805_v48  ;;  %v1870_v8 = vadd.f32 %v1838_v41, %v3078_v25 }
 0x2c8   : > { %1886 = vst [vmem:[%s2725_s28 + $0x60] sm:$0xff] %v1854_v14  ;;  %v1871_v53 = vadd.f32 %v1839_v7, %v3081_v51  ;;  %v1872_v28 = vadd.f32 %v1840_v37, %v3118_v56 }
 0x2c9   : > { %1887 = vst [vmem:[%s2725_s28 + $0x68] sm:$0xff] %v1855_v16  ;;  %v1873_v31 = vadd.f32 %v1841_v18, %v3603_v21 }
 0x2ca   : > { %1888 = vst [vmem:[%s2725_s28 + $0x70] sm:$0xff] %v1856_v17 }
 0x2cb   : > { %1889 = vst [vmem:[%s2725_s28 + $0x78] sm:$0xff] %v1857_v19 }
 0x2cc   : > { %1890 = vst [vmem:[%s2725_s28 + $0x80] sm:$0xff] %v1858_v20 }
 0x2cd   : > { %1891 = vst [vmem:[%s2725_s28 + $0x88] sm:$0xff] %v1859_v26 }
 0x2ce   : > { %1892 = vst [vmem:[%s2725_s28 + $0x90] sm:$0xff] %v1860_v27 }
 0x2cf   : > { %1893 = vst [vmem:[%s2725_s28 + $0x98] sm:$0xff] %v1861_v38 }
 0x2d0   : > { %1894 = vst [vmem:[%s2725_s28 + $0xa0] sm:$0xff] %v1862_v39 }
 0x2d1   : > { %1895 = vst [vmem:[%s2725_s28 + $0xa8] sm:$0xff] %v1863_v6 }
 0x2d2   : > { %1896 = vst [vmem:[%s2725_s28 + $0xb0] sm:$0xff] %v1864_v9 }
 0x2d3   : > { %1897 = vst [vmem:[%s2725_s28 + $0xb8] sm:$0xff] %v1865_v63 }
 0x2d4   : > { %1898 = vst [vmem:[%s2725_s28 + $0xc0] sm:$0xff] %v1866_v2 }
 0x2d5   : > { %1899 = vst [vmem:[%s2725_s28 + $0xc8] sm:$0xff] %v1867_v32 }
 0x2d6   : > { %1900 = vst [vmem:[%s2725_s28 + $0xd0] sm:$0xff] %v1868_v33 }
 0x2d7   : > { %1901 = vst [vmem:[%s2725_s28 + $0xd8] sm:$0xff] %v1869_v62 }
 0x2d8   : > { %1902 = vst [vmem:[%s2725_s28 + $0xe0] sm:$0xff] %v1870_v8 }
 0x2d9   : > { %1903 = vst [vmem:[%s2725_s28 + $0xe8] sm:$0xff] %v1871_v53 }
 0x2da   : > { %1904 = vst [vmem:[%s2725_s28 + $0xf0] sm:$0xff] %v1872_v28 }
 0x2db   : > { %1905 = vst [vmem:[%s2725_s28 + $0xf8] sm:$0xff] %v1873_v31 }
 0x2dc PF: > { %s2217_s23 = sshll.u32 %s2535_s24, 8  ;;  %s1919_s12 = sshll.u32 %s2725_s28, 4  ;;  %s1920_s12 = int_to_ptr.vmem [resolvable:$true] %s1919_s12 }
 0x2dd   : > { %s1918_s11 = scalar_lea.hbm %s3583_s5, %s2217_s23  ;;  %s3604_s17 = sand.u32 1, %s2515_s19  }
 0x2de   : > { %s1921_s16 = sshll.u32 %s1918_s11, 4  ;;  %s1907_s7 = scalar_lea.sflag [#allocation5], %s3604_s17  ;;  %s1922_s16 = int_to_ptr.hbm [resolvable:$true] %s1921_s16 }
 0x2df   : > { %s2451_s8 = sshra.s32 %s1922_s16, 4  ;;  %s2457_s24 = scalar_lea.hbm %s3583_s5, 512  ;;  %s2452_s8 = int_to_ptr.hbm [resolvable:$true] %s2451_s8 }
 0x2e0   : > { %s2453_s29 = scalar_lea.hbm %s2452_s8, 256  ;;  %p2458_p13 = scmp.lt.s32.totalorder %s2452_s8, %s3583_s5 }
 0x2e1   : > { %p2454_p8 = scmp.ne.s32.totalorder %s2452_s8, %s2453_s29  ;;  %p2459_p0 = scmp.lt.s32.totalorder %s2457_s24, %s2453_s29 }
 0x2e3   : > { %p2455_p9 = pnand %p2454_p8, %p2661_p10  ;;  %p2460_p1 = por %p2459_p0, %p2458_p13 }
 0x2e5   : > { %p2456_p11 = pneg %p2455_p9 }
 0x2e7   : > { %p2461_p2 = pnand %p2460_p1, %p2456_p11 }
 0x2e9   : > { %2464 = shalt.err (!%p2461_p2)
}
 0x2ea   : > { %s2550_s28 = smov 128   ;;  %s2551_s22 = smov 8  }
 0x2eb   : > { %2218 = dma.vmem_to_hbm [thread:$0]  (%p2661_p10), %s1920_s12, 4096, %s1922_s16, %s1907_s7, %s2550_s28, %s2550_s28, %s2551_s22  }
 0x2ec PF: > { %p2224_p3 = scmp.ge.s32.totalorder %s2547_s27, 2  ;;  %s1936_s25 = sand.u32 1, %s2511_s18  }
 0x2ed   : > { %s1937_s26 = scalar_lea.sflag [#allocation5], %s1936_s25 }
 0x2ee   : > { %p2221_p4 = pnand %p2224_p3, %p2668_p12 }
 0x2f0   : > { %p2222_p5 = pneg %p2221_p4 }
 0x2f2   : > { %2506 = dma.done.wait (%p2222_p5), %s1937_s26, 4096  }
 0x2f3   : > { %2508 = vsyncadd (%p2222_p5), %s1937_s26, 4294963200  ;;  %s18_s27 = sadd.s32 1, %s2547_s27   ;;  %s3605_s21 = sld [smem:[#allocation7_spill]] }
 0x2f4   : > { %p15_p6 = scmp.ge.s32.totalorder %s18_s27, 6   ;;  %s3606_s22 = sld [smem:[#allocation12_spill]] }
 0x2f5   : > { %s3607_s23 = sld [smem:[#allocation8_spill]]  ;;  %s3611_s18 = smov %s2515_s19 }
 0x2f6   : > { %s3608_s24 = sld [smem:[#allocation9_spill]]  ;;  %s3612_s19 = smov %s2519_s20 }
 0x2f7   : > { %s3609_s25 = sld [smem:[#allocation10_spill]]  ;;  %s3613_s20 = smov %s2666_s14 }
 0x2f8   : > { %s3610_s26 = sld [smem:[#allocation11_spill]]  ;;  %17 = sbr.rel (!%p15_p6) target bundleno = 8 (0x8), region = 135 }
 0x2fd   :  { %1943 = vsyncpa [#allocation5], 1 }
 0x2fe   :  { %1945 = vsyncpa [#allocation5 + $0x1], 1 }

</bundles_post_ra>
